<compile_context>
chip_gen: v5e
topology: v5e:2x2
jax: 0.10.0
libtpu: 0.0.40
codegen_flags: <defaults>
</compile_context>

<pallas_src>
import math

import jax
import jax.numpy as jnp
from jax import lax
from jax.experimental import pallas as pl
from jax.experimental.pallas import tpu as pltpu


# ---------------------------------------------------------------------------
# Shared head epilogue: ReLU(h1_pre + b1) @ W2 + b2      (Dropout = identity)
# Works on Pallas Refs and on plain jnp arrays (used by the references too).
# ---------------------------------------------------------------------------
def _head_final(h1_pre, b1_ref, w2_ref, b2_ref):
    h1 = jnp.maximum(h1_pre + b1_ref[...], 0.0)
    out_size = w2_ref.shape[0]
    if out_size == 1:
        # (B,128)x(128,1): VPU multiply + lane reduce instead of a 1-column MXU push.
        o = jnp.sum(h1 * w2_ref[...], axis=-1, keepdims=True)
    else:
        # contract the 128-dim of h1 with the 128-dim of (out, 128) w2
        o = lax.dot_general(h1, w2_ref[...], (((1,), (1,)), ((), ())),
                            preferred_element_type=jnp.float32)
    return o + b2_ref[...]


# ---------------------------------------------------------------------------
# Fast path: one grid-less fused kernel, everything VMEM-resident.
# ---------------------------------------------------------------------------
def multibranch_fused_kernel(x_lc_ref, x_gc_ref, x_trans_ref, w_hbm_ref,
                             b_ref, w1_ref, b1_ref, w2_ref, b2_ref,
                             out_ref, w_vmem, xpad_vmem, dma_sem):
    """x_*_ref: (B, in_*) f32 raw branch inputs (VMEM)
       w_hbm_ref: (3, depth, H, H) bf16 folded branch weights (HBM, manual DMA)
       b_ref:   (3, depth, 1, H) f32 folded branch biases
       w1_ref:  (3, H, 128) bf16 head Linear1 weight (split per branch, last BN folded)
       b1_ref:  (1, 128) f32, w2_ref: (out, 128) f32, b2_ref: (1, out) f32
       out_ref: (B, out) f32
       scratch: w_vmem (3, depth, H, H) bf16, xpad_vmem (B, H) bf16, dma_sem DMA((3,))
    """
    n_branch = w_vmem.shape[0]
    depth = w_vmem.shape[1]

    # Kick off all per-branch weight DMAs (HBM -> VMEM) up front; branch b only
    # waits on its own copy, so branch-0 compute overlaps branches 1-2's DMA.
    copies = [pltpu.make_async_copy(w_hbm_ref.at[br], w_vmem.at[br], dma_sem.at[br])
              for br in range(n_branch)]
    for cp in copies:
        cp.start()

    x_refs = (x_lc_ref, x_gc_ref, x_trans_ref)
    branch_out = []
    for br in range(n_branch):
        # In-kernel pad + cast of the branch input (replaces the wrapper-side
        # jnp.pad / jnp.stack / astype -> one fewer XLA dispatch + HBM trip).
        in_size = x_refs[br].shape[1]
        xpad_vmem[...] = jnp.zeros_like(xpad_vmem)
        xpad_vmem[:, 0:in_size] = x_refs[br][...].astype(jnp.bfloat16)
        h = xpad_vmem[...]                                   # (B, H) bf16

        copies[br].wait()                                    # this branch's weights ready

        # Branch-major, fully unrolled straight-line loops (30 MXU pushes).
        # Layer-major interleaving would hide MRF pop latency on v5e/v6e but is
        # only worth committing after a bundle dump shows exposed stalls.
        for layer in range(depth):
            y = jnp.dot(h, w_vmem[br, layer],
                        preferred_element_type=jnp.float32)  # MXU, f32 acc
            y = jnp.maximum(y + b_ref[br, layer], 0.0)       # bias + ReLU (f32 VPU)
            # BN(eval) is folded into the next layer's weights; Dropout = identity.
            h = y.astype(jnp.bfloat16)
        branch_out.append(h)                                 # (B, H) bf16

    # Head Linear(3H -> 128): the concat is a sum of per-branch (B,H)x(H,128) dots.
    h1 = jnp.dot(branch_out[0], w1_ref[0], preferred_element_type=jnp.float32)
    for br in range(1, n_branch):
        h1 = h1 + jnp.dot(branch_out[br], w1_ref[br],
                          preferred_element_type=jnp.float32)
    out_ref[...] = _head_final(h1, b1_ref, w2_ref, b2_ref)


# ---------------------------------------------------------------------------
# Fallback path for weight sets too large for VMEM (e.g. big hidden/depth on
# v7x's 64 MiB): grid=(branch, layer), per-(branch,layer) weight block,
# activation carried in VMEM scratch, head-input accumulated across branches.
# ---------------------------------------------------------------------------
def multibranch_grid_kernel(x_ref, w_ref, b_ref, w1_ref, b1_ref, w2_ref, b2_ref,
                            out_ref, h_carry, h1_acc):
    br = pl.program_id(0)
    layer = pl.program_id(1)
    n_branch = pl.num_programs(0)
    depth = pl.num_programs(1)

    @pl.when(layer == 0)
    def _():
        h_carry[...] = x_ref[...]                            # padded bf16 branch input

    y = jnp.dot(h_carry[...], w_ref[...], preferred_element_type=jnp.float32)
    y = jnp.maximum(y + b_ref[...], 0.0)
    h_carry[...] = y.astype(jnp.bfloat16)

    @pl.when(layer == depth - 1)
    def _():
        @pl.when(br == 0)
        def _():
            h1_acc[...] = jnp.zeros_like(h1_acc)
        h1_acc[...] += jnp.dot(h_carry[...], w1_ref[...],
                               preferred_element_type=jnp.float32)

        @pl.when(br == n_branch - 1)
        def _():
            out_ref[...] = _head_final(h1_acc[...], b1_ref, w2_ref, b2_ref)


# ---------------------------------------------------------------------------
# Wrapper with the size gate.
# ---------------------------------------------------------------------------
def _vmem_spec():
    return pl.BlockSpec(memory_space=pltpu.MemorySpace.VMEM)


def _nbytes(a):
    return int(a.size) * int(jnp.dtype(a.dtype).itemsize)


def _vmem_capacity_bytes():
    try:
        return int(pltpu.get_tpu_info().vmem_capacity_bytes)
    except Exception:
        return 64 * 1024 * 1024      # conservative: v7x physical VMEM per TensorCore


def multibranch_forward(x_lc, x_gc, x_trans, params, *, force_grid=False):
    w, b, w1, b1, w2t, b2 = params
    n_branch, depth, hidden = w.shape[0], w.shape[1], w.shape[-1]
    head_width = w1.shape[-1]
    batch = x_lc.shape[0]
    out_size = w2t.shape[0]

    flops = 2 * batch * (n_branch * depth * hidden * hidden
                         + n_branch * hidden * head_width
                         + head_width * out_size)
    bytes_accessed = (sum(_nbytes(a) for a in (w, b, w1, b1, w2t, b2))
                      + sum(_nbytes(a) for a in (x_lc, x_gc, x_trans))
                      + batch * out_size * 4)
    cost = pl.CostEstimate(flops=flops, transcendentals=0,
                           bytes_accessed=bytes_accessed)

    # Fully-resident fast-path VMEM footprint (weight scratch dominates).
    resident = _nbytes(w) + _nbytes(b) + _nbytes(w1)
    capacity = _vmem_capacity_bytes()
    use_grid = force_grid or (2 * resident > capacity)   # headroom for I/O buffers

    if not use_grid:
        compiler_params = None
        if resident > 16 * 1024 * 1024:   # above the smallest default scoped limit
            compiler_params = pltpu.CompilerParams(
                vmem_limit_bytes=int(min(0.9 * capacity, 2 * resident)))
        return pl.pallas_call(
            multibranch_fused_kernel,
            out_shape=jax.ShapeDtypeStruct((batch, out_size), jnp.float32),
            in_specs=[
                _vmem_spec(), _vmem_spec(), _vmem_spec(),   # raw branch inputs
                pl.BlockSpec(memory_space=pl.ANY),          # branch weights stay in HBM
                _vmem_spec(), _vmem_spec(), _vmem_spec(),   # b, w1, b1
                _vmem_spec(), _vmem_spec(),                 # w2t, b2
            ],
            out_specs=_vmem_spec(),
            scratch_shapes=[
                pltpu.VMEM((n_branch, depth, hidden, hidden), jnp.bfloat16),
                pltpu.VMEM((batch, hidden), jnp.bfloat16),
                pltpu.SemaphoreType.DMA((n_branch,)),
            ],
            compiler_params=compiler_params,
            cost_estimate=cost,
        )(x_lc, x_gc, x_trans, w, b, w1, b1, w2t, b2)

    # ---- large-weight fallback: per-(branch, layer) weight blocks ----
    # (Wrapper-side pad/stack is negligible in this regime.)
    def _pad(x):
        return jnp.pad(x, ((0, 0), (0, hidden - x.shape[1])))
    xs = jnp.stack([_pad(x_lc), _pad(x_gc), _pad(x_trans)]).astype(jnp.bfloat16)

    return pl.pallas_call(
        multibranch_grid_kernel,
        out_shape=jax.ShapeDtypeStruct((batch, out_size), jnp.float32),
        grid=(n_branch, depth),
        in_specs=[
            pl.BlockSpec((None, batch, hidden), lambda i, l: (i, 0, 0)),
            pl.BlockSpec((None, None, hidden, hidden), lambda i, l: (i, l, 0, 0)),
            pl.BlockSpec((None, None, 1, hidden), lambda i, l: (i, l, 0, 0)),
            pl.BlockSpec((None, hidden, head_width), lambda i, l: (i, 0, 0)),
            pl.BlockSpec((1, head_width), lambda i, l: (0, 0)),
            pl.BlockSpec((out_size, head_width), lambda i, l: (0, 0)),
            pl.BlockSpec((1, out_size), lambda i, l: (0, 0)),
        ],
        out_specs=pl.BlockSpec((batch, out_size), lambda i, l: (0, 0)),
        scratch_shapes=[
            pltpu.VMEM((batch, hidden), jnp.bfloat16),      # activation carry
            pltpu.VMEM((batch, head_width), jnp.float32),   # head-input accumulator
        ],
        compiler_params=pltpu.CompilerParams(
            dimension_semantics=("arbitrary", "arbitrary")),
        cost_estimate=cost,
    )(xs, w, b, w1, b1, w2t, b2)


# ---------------------------------------------------------------------------
# Deterministic parameters (mirroring the nn.Module shapes) + exact BN folding.
# ---------------------------------------------------------------------------
def make_raw_params(key, input_sizes, hidden, output_size, depth, head_width=128):
    """Raw f32 params with the original structure (Linear W/b + BN gamma/beta/mean/var)."""
    branches = []
    for in_size in input_sizes:
        layers = []
        for layer in range(depth):
            fan_in = in_size if layer == 0 else hidden
            key, kw, kb, kg, kbt, km, kv = jax.random.split(key, 7)
            bound = 1.0 / math.sqrt(fan_in)
            layers.append(dict(
                w=jax.random.uniform(kw, (fan_in, hidden), jnp.float32, -bound, bound),
                b=jax.random.uniform(kb, (hidden,), jnp.float32, -bound, bound),
                gamma=jax.random.uniform(kg, (hidden,), jnp.float32, 0.5, 1.5),
                beta=jax.random.uniform(kbt, (hidden,), jnp.float32, -0.5, 0.5),
                mean=jax.random.uniform(km, (hidden,), jnp.float32, -0.5, 0.5),
                var=jax.random.uniform(kv, (hidden,), jnp.float32, 0.5, 1.5),
            ))
        branches.append(layers)

    key, k1, k2, k3, k4 = jax.random.split(key, 5)
    in1 = hidden * len(input_sizes)
    bound1 = 1.0 / math.sqrt(in1)
    bound2 = 1.0 / math.sqrt(head_width)
    head = dict(
        w1=jax.random.uniform(k1, (in1, head_width), jnp.float32, -bound1, bound1),
        b1=jax.random.uniform(k2, (head_width,), jnp.float32, -bound1, bound1),
        w2=jax.random.uniform(k3, (head_width, output_size), jnp.float32, -bound2, bound2),
        b2=jax.random.uniform(k4, (output_size,), jnp.float32, -bound2, bound2),
    )
    return dict(branches=branches, head=head), key


def fold_params(raw, hidden, eps=1e-5):
    """Fold BN(eval) of layer l into layer l+1's Linear (last BN -> head Linear1),
    zero-pad layer-0 weights to (H, H), cast matmul weights to bf16 (biases f32).
    Eval-mode only: regenerate if BN stats/params change."""
    branches = raw["branches"]
    n_branch = len(branches)
    w_all, b_all, last_scale, last_shift = [], [], [], []
    for layers in branches:
        ws, bs = [], []
        prev_scale = prev_shift = None
        for layer, p in enumerate(layers):
            w, bvec = p["w"], p["b"]
            scale = p["gamma"] / jnp.sqrt(p["var"] + eps)
            shift = p["beta"] - p["mean"] * scale
            if layer > 0:                        # fold previous layer's BN here
                bvec = bvec + prev_shift @ w     # uses the raw weight
                w = prev_scale[:, None] * w
            if w.shape[0] < hidden:              # pad rows -> uniform (H, H)
                w = jnp.pad(w, ((0, hidden - w.shape[0]), (0, 0)))
            ws.append(w)
            bs.append(bvec.reshape(1, hidden))
            prev_scale, prev_shift = scale, shift
        w_all.append(jnp.stack(ws))
        b_all.append(jnp.stack(bs))
        last_scale.append(prev_scale)
        last_shift.append(prev_shift)

    head = raw["head"]
    w1, b1 = head["w1"], head["b1"]
    head_width = w1.shape[1]
    w1_blocks, b1_fold = [], b1
    for br in range(n_branch):
        blk = w1[br * hidden:(br + 1) * hidden]
        b1_fold = b1_fold + last_shift[br] @ blk
        w1_blocks.append(last_scale[br][:, None] * blk)

    return (
        jnp.stack(w_all).astype(jnp.bfloat16),      # (3, depth, H, H)  bf16
        jnp.stack(b_all),                           # (3, depth, 1, H)  f32
        jnp.stack(w1_blocks).astype(jnp.bfloat16),  # (3, H, 128)       bf16
        b1_fold.reshape(1, head_width),             # (1, 128)          f32
        jnp.transpose(head["w2"]),                  # (out, 128)        f32
        head["b2"].reshape(1, -1),                  # (1, out)          f32
    )


# ---------------------------------------------------------------------------
# References.
# ---------------------------------------------------------------------------
def reference_forward_bf16(x_lc, x_gc, x_trans, params):
    """Plain-JAX mirror of the kernel's folded bf16 arithmetic (tight check)."""
    w, b, w1, b1, w2t, b2 = params
    hidden = w.shape[-1]
    n_branch, depth = w.shape[0], w.shape[1]
    outs = []
    for br, x in enumerate((x_lc, x_gc, x_trans)):
        h = jnp.pad(x, ((0, 0), (0, hidden - x.shape[1]))).astype(jnp.bfloat16)
        for layer in range(depth):
            y = jnp.dot(h, w[br, layer], preferred_element_type=jnp.float32)
            y = jnp.maximum(y + b[br, layer], 0.0)
            h = y.astype(jnp.bfloat16)
        outs.append(h)
    h1 = jnp.dot(outs[0], w1[0], preferred_element_type=jnp.float32)
    for br in range(1, n_branch):
        h1 = h1 + jnp.dot(outs[br], w1[br], preferred_element_type=jnp.float32)
    return _head_final(h1, b1, w2t, b2)


def reference_forward_f32(x_lc, x_gc, x_trans, raw_params, eps=1e-5):
    """Original eval-mode op order in f32 with UNFOLDED params:
    [Linear -> ReLU -> BN(eval) -> Dropout(id)] x depth, concat,
    Linear -> ReLU -> Dropout(id) -> Linear."""
    outs = []
    for x, layers in zip((x_lc, x_gc, x_trans), raw_params["branches"]):
        h = x
        for p in layers:
            h = jnp.maximum(h @ p["w"] + p["b"], 0.0)
            scale = p["gamma"] / jnp.sqrt(p["var"] + eps)
            h = (h - p["mean"]) * scale + p["beta"]
        outs.append(h)
    merged = jnp.concatenate(outs, axis=1)
    head = raw_params["head"]
    h1 = jnp.maximum(merged @ head["w1"] + head["b1"], 0.0)
    return h1 @ head["w2"] + head["b2"]


# ---------------------------------------------------------------------------
if __name__ == "__main__":
    batch = 8
    lc_size, gc_size, trans_size = 16, 24, 8
    hidden_size = 128
    output_size = 1
    depth = 10

    key = jax.random.PRNGKey(0)
    key, kx1, kx2, kx3 = jax.random.split(key, 4)
    x_lc = jax.random.normal(kx1, (batch, lc_size), jnp.float32)
    x_gc = jax.random.normal(kx2, (batch, gc_size), jnp.float32)
    x_trans = jax.random.normal(kx3, (batch, trans_size), jnp.float32)

    raw, key = make_raw_params(key, (lc_size, gc_size, trans_size),
                               hidden_size, output_size, depth)
    params = fold_params(raw, hidden_size)

    fwd = jax.jit(multibranch_forward, static_argnames=("force_grid",))
    out = jax.block_until_ready(fwd(x_lc, x_gc, x_trans, params))

    # Exercise the large-weight grid fallback too (forced at these small sizes)
    # so the size-gated path is verified rather than documentation-only.
    out_grid = jax.block_until_ready(
        fwd(x_lc, x_gc, x_trans, params, force_grid=True))

    ref_bf16 = jax.block_until_ready(
        jax.jit(reference_forward_bf16)(x_lc, x_gc, x_trans, params))
    ref_f32 = jax.block_until_ready(
        jax.jit(reference_forward_f32)(x_lc, x_gc, x_trans, raw))

    assert out.shape == (batch, output_size), out.shape
    assert bool(jnp.all(jnp.isfinite(out)))

    # Kernel vs a bf16 mirror of the exact same folded arithmetic (tight).
    err_mirror = float(jnp.max(jnp.abs(out - ref_bf16)))
    assert bool(jnp.allclose(out, ref_bf16, rtol=1e-2, atol=1e-2)), err_mirror

    # Kernel vs the original f32 model (unfolded params, Linear->ReLU->BN order).
    # Tolerance documents the expected bf16 weight/activation drift accumulated
    # across the deep matmul chain (typically well under 5e-2 absolute here).
    err_f32 = float(jnp.max(jnp.abs(out - ref_f32)))
    assert bool(jnp.allclose(out, ref_f32, rtol=1e-1, atol=1e-1)), err_f32

    # Grid fallback must match the fused fast path.
    err_grid = float(jnp.max(jnp.abs(out_grid - out)))
    assert bool(jnp.allclose(out_grid, out, rtol=1e-2, atol=1e-2)), err_grid

    print("KERNEL_OK")
</pallas_src>

<mosaic_0001>
module attributes {stable_mosaic.version = 11 : i64} {
  func.func @multibranch_fused_kernel(%arg0: memref<8x16xf32, #tpu.memory_space<vmem>>, %arg1: memref<8x24xf32, #tpu.memory_space<vmem>>, %arg2: memref<8x8xf32, #tpu.memory_space<vmem>>, %arg3: memref<3x10x128x128xbf16, #tpu.memory_space<any>>, %arg4: memref<3x10x1x128xf32, #tpu.memory_space<vmem>>, %arg5: memref<3x128x128xbf16, #tpu.memory_space<vmem>>, %arg6: memref<1x128xf32, #tpu.memory_space<vmem>>, %arg7: memref<1x128xf32, #tpu.memory_space<vmem>>, %arg8: memref<1x1xf32, #tpu.memory_space<vmem>>, %arg9: memref<8x1xf32, #tpu.memory_space<vmem>>, %arg10: memref<3x10x128x128xbf16, #tpu.memory_space<vmem>>, %arg11: memref<8x128xbf16, #tpu.memory_space<vmem>>, %arg12: memref<3x!tpu.dma_semaphore, #tpu.memory_space<semaphore_mem>>) attributes {dimension_semantics = [], scalar_prefetch = 0 : i64, scratch_operands = 3 : i64, tpu.core_type = #tpu.core_type<tc>} {
    %c0_i32 = arith.constant 0 : i32
    %c0_i32_0 = arith.constant 0 : i32
    %c0_i32_1 = arith.constant 0 : i32
    %c0_i32_2 = arith.constant 0 : i32
    %c0_i32_3 = arith.constant 0 : i32
    %c0_i32_4 = arith.constant 0 : i32
    %0 = tpu.memref_slice %arg3[%c0_i32, %c0_i32_2, %c0_i32_3, %c0_i32_4] : memref<3x10x128x128xbf16, #tpu.memory_space<any>> -> memref<1x10x128x128xbf16, #tpu.memory_space<any>>
    %1 = tpu.memref_squeeze %0 : memref<1x10x128x128xbf16, #tpu.memory_space<any>> -> memref<10x128x128xbf16, #tpu.memory_space<any>>
    %c0_i32_5 = arith.constant 0 : i32
    %c0_i32_6 = arith.constant 0 : i32
    %c0_i32_7 = arith.constant 0 : i32
    %2 = tpu.memref_slice %arg10[%c0_i32_0, %c0_i32_5, %c0_i32_6, %c0_i32_7] : memref<3x10x128x128xbf16, #tpu.memory_space<vmem>> -> memref<1x10x128x128xbf16, #tpu.memory_space<vmem>>
    %3 = tpu.memref_squeeze %2 : memref<1x10x128x128xbf16, #tpu.memory_space<vmem>> -> memref<10x128x128xbf16, #tpu.memory_space<vmem>>
    %4 = tpu.memref_slice %arg12[%c0_i32_1] : memref<3x!tpu.dma_semaphore, #tpu.memory_space<semaphore_mem>> -> memref<1x!tpu.dma_semaphore, #tpu.memory_space<semaphore_mem>>
    %5 = tpu.memref_squeeze %4 : memref<1x!tpu.dma_semaphore, #tpu.memory_space<semaphore_mem>> -> memref<!tpu.dma_semaphore, #tpu.memory_space<semaphore_mem>>
    tpu.enqueue_dma source(%1 : memref<10x128x128xbf16, #tpu.memory_space<any>>) target(%3 : memref<10x128x128xbf16, #tpu.memory_space<vmem>>) target_semaphore(%5 : memref<!tpu.dma_semaphore, #tpu.memory_space<semaphore_mem>>)
    %c1_i32 = arith.constant 1 : i32
    %c1_i32_8 = arith.constant 1 : i32
    %c1_i32_9 = arith.constant 1 : i32
    %c0_i32_10 = arith.constant 0 : i32
    %c0_i32_11 = arith.constant 0 : i32
    %c0_i32_12 = arith.constant 0 : i32
    %6 = tpu.memref_slice %arg3[%c1_i32, %c0_i32_10, %c0_i32_11, %c0_i32_12] : memref<3x10x128x128xbf16, #tpu.memory_space<any>> -> memref<1x10x128x128xbf16, #tpu.memory_space<any>>
    %7 = tpu.memref_squeeze %6 : memref<1x10x128x128xbf16, #tpu.memory_space<any>> -> memref<10x128x128xbf16, #tpu.memory_space<any>>
    %c0_i32_13 = arith.constant 0 : i32
    %c0_i32_14 = arith.constant 0 : i32
    %c0_i32_15 = arith.constant 0 : i32
    %8 = tpu.memref_slice %arg10[%c1_i32_8, %c0_i32_13, %c0_i32_14, %c0_i32_15] : memref<3x10x128x128xbf16, #tpu.memory_space<vmem>> -> memref<1x10x128x128xbf16, #tpu.memory_space<vmem>>
    %9 = tpu.memref_squeeze %8 : memref<1x10x128x128xbf16, #tpu.memory_space<vmem>> -> memref<10x128x128xbf16, #tpu.memory_space<vmem>>
    %10 = tpu.memref_slice %arg12[%c1_i32_9] : memref<3x!tpu.dma_semaphore, #tpu.memory_space<semaphore_mem>> -> memref<1x!tpu.dma_semaphore, #tpu.memory_space<semaphore_mem>>
    %11 = tpu.memref_squeeze %10 : memref<1x!tpu.dma_semaphore, #tpu.memory_space<semaphore_mem>> -> memref<!tpu.dma_semaphore, #tpu.memory_space<semaphore_mem>>
    tpu.enqueue_dma source(%7 : memref<10x128x128xbf16, #tpu.memory_space<any>>) target(%9 : memref<10x128x128xbf16, #tpu.memory_space<vmem>>) target_semaphore(%11 : memref<!tpu.dma_semaphore, #tpu.memory_space<semaphore_mem>>)
    %c2_i32 = arith.constant 2 : i32
    %c2_i32_16 = arith.constant 2 : i32
    %c2_i32_17 = arith.constant 2 : i32
    %c0_i32_18 = arith.constant 0 : i32
    %c0_i32_19 = arith.constant 0 : i32
    %c0_i32_20 = arith.constant 0 : i32
    %12 = tpu.memref_slice %arg3[%c2_i32, %c0_i32_18, %c0_i32_19, %c0_i32_20] : memref<3x10x128x128xbf16, #tpu.memory_space<any>> -> memref<1x10x128x128xbf16, #tpu.memory_space<any>>
    %13 = tpu.memref_squeeze %12 : memref<1x10x128x128xbf16, #tpu.memory_space<any>> -> memref<10x128x128xbf16, #tpu.memory_space<any>>
    %c0_i32_21 = arith.constant 0 : i32
    %c0_i32_22 = arith.constant 0 : i32
    %c0_i32_23 = arith.constant 0 : i32
    %14 = tpu.memref_slice %arg10[%c2_i32_16, %c0_i32_21, %c0_i32_22, %c0_i32_23] : memref<3x10x128x128xbf16, #tpu.memory_space<vmem>> -> memref<1x10x128x128xbf16, #tpu.memory_space<vmem>>
    %15 = tpu.memref_squeeze %14 : memref<1x10x128x128xbf16, #tpu.memory_space<vmem>> -> memref<10x128x128xbf16, #tpu.memory_space<vmem>>
    %16 = tpu.memref_slice %arg12[%c2_i32_17] : memref<3x!tpu.dma_semaphore, #tpu.memory_space<semaphore_mem>> -> memref<1x!tpu.dma_semaphore, #tpu.memory_space<semaphore_mem>>
    %17 = tpu.memref_squeeze %16 : memref<1x!tpu.dma_semaphore, #tpu.memory_space<semaphore_mem>> -> memref<!tpu.dma_semaphore, #tpu.memory_space<semaphore_mem>>
    tpu.enqueue_dma source(%13 : memref<10x128x128xbf16, #tpu.memory_space<any>>) target(%15 : memref<10x128x128xbf16, #tpu.memory_space<vmem>>) target_semaphore(%17 : memref<!tpu.dma_semaphore, #tpu.memory_space<semaphore_mem>>)
    %cst = arith.constant 0.000000e+00 : bf16
    %18 = vector.broadcast %cst : bf16 to vector<8x128xbf16>
    %c0 = arith.constant 0 : index
    %c0_24 = arith.constant 0 : index
    %19 = vector.load %arg11[%c0, %c0_24] : memref<8x128xbf16, #tpu.memory_space<vmem>>, vector<8x128xbf16>
    tpu.vector_store %arg11[%c0, %c0_24], %18 {strides = array<i32>} : memref<8x128xbf16, #tpu.memory_space<vmem>>, vector<8x128xbf16>,
    %c0_25 = arith.constant 0 : index
    %c0_26 = arith.constant 0 : index
    %20 = vector.load %arg0[%c0_25, %c0_26] : memref<8x16xf32, #tpu.memory_space<vmem>>, vector<8x16xf32>
    %21 = arith.truncf %20 : vector<8x16xf32> to vector<8x16xbf16>
    %c0_27 = arith.constant 0 : index
    %c0_28 = arith.constant 0 : index
    %22 = vector.load %arg11[%c0_27, %c0_28] : memref<8x128xbf16, #tpu.memory_space<vmem>>, vector<8x16xbf16>
    tpu.vector_store %arg11[%c0_27, %c0_28], %21 {strides = array<i32>} : memref<8x128xbf16, #tpu.memory_space<vmem>>, vector<8x16xbf16>,
    %c0_29 = arith.constant 0 : index
    %c0_30 = arith.constant 0 : index
    %23 = vector.load %arg11[%c0_29, %c0_30] : memref<8x128xbf16, #tpu.memory_space<vmem>>, vector<8x128xbf16>
    %c0_i32_31 = arith.constant 0 : i32
    %c0_i32_32 = arith.constant 0 : i32
    %c0_i32_33 = arith.constant 0 : i32
    %c0_i32_34 = arith.constant 0 : i32
    %c0_i32_35 = arith.constant 0 : i32
    %c0_i32_36 = arith.constant 0 : i32
    %24 = tpu.memref_slice %arg3[%c0_i32_31, %c0_i32_34, %c0_i32_35, %c0_i32_36] : memref<3x10x128x128xbf16, #tpu.memory_space<any>> -> memref<1x10x128x128xbf16, #tpu.memory_space<any>>
    %25 = tpu.memref_squeeze %24 : memref<1x10x128x128xbf16, #tpu.memory_space<any>> -> memref<10x128x128xbf16, #tpu.memory_space<any>>
    %c0_i32_37 = arith.constant 0 : i32
    %c0_i32_38 = arith.constant 0 : i32
    %c0_i32_39 = arith.constant 0 : i32
    %26 = tpu.memref_slice %arg10[%c0_i32_32, %c0_i32_37, %c0_i32_38, %c0_i32_39] : memref<3x10x128x128xbf16, #tpu.memory_space<vmem>> -> memref<1x10x128x128xbf16, #tpu.memory_space<vmem>>
    %27 = tpu.memref_squeeze %26 : memref<1x10x128x128xbf16, #tpu.memory_space<vmem>> -> memref<10x128x128xbf16, #tpu.memory_space<vmem>>
    %28 = tpu.memref_slice %arg12[%c0_i32_33] : memref<3x!tpu.dma_semaphore, #tpu.memory_space<semaphore_mem>> -> memref<1x!tpu.dma_semaphore, #tpu.memory_space<semaphore_mem>>
    %29 = tpu.memref_squeeze %28 : memref<1x!tpu.dma_semaphore, #tpu.memory_space<semaphore_mem>> -> memref<!tpu.dma_semaphore, #tpu.memory_space<semaphore_mem>>
    tpu.wait_dma2 semaphore(%29 : memref<!tpu.dma_semaphore, #tpu.memory_space<semaphore_mem>>) src(%25 : memref<10x128x128xbf16, #tpu.memory_space<any>>) dst(%27 : memref<10x128x128xbf16, #tpu.memory_space<vmem>>)
    %c0_40 = arith.constant 0 : index
    %c0_41 = arith.constant 0 : index
    %c0_42 = arith.constant 0 : index
    %c0_43 = arith.constant 0 : index
    %30 = vector.load %arg10[%c0_40, %c0_41, %c0_42, %c0_43] : memref<3x10x128x128xbf16, #tpu.memory_space<vmem>>, vector<1x1x128x128xbf16>
    %31 = vector.shape_cast %30 : vector<1x1x128x128xbf16> to vector<128x128xbf16>
    %cst_44 = arith.constant dense<0.000000e+00> : vector<8x128xf32>
    %32 = tpu.matmul %23, %31, %cst_44 {dimension_numbers = #tpu.dot_dimension_numbers<[1], [0], [0], [1], [0, 0, 1, 1], [], []>} : vector<8x128xbf16>, vector<128x128xbf16>, vector<8x128xf32> -> vector<8x128xf32>
    %c0_45 = arith.constant 0 : index
    %c0_46 = arith.constant 0 : index
    %c0_47 = arith.constant 0 : index
    %c0_48 = arith.constant 0 : index
    %33 = vector.load %arg4[%c0_45, %c0_46, %c0_47, %c0_48] : memref<3x10x1x128xf32, #tpu.memory_space<vmem>>, vector<1x1x1x128xf32>
    %34 = vector.shape_cast %33 : vector<1x1x1x128xf32> to vector<1x128xf32>
    %35 = vector.broadcast %34 : vector<1x128xf32> to vector<8x128xf32>
    %36 = arith.addf %32, %35 : vector<8x128xf32>
    %cst_49 = arith.constant 0.000000e+00 : f32
    %37 = vector.broadcast %cst_49 : f32 to vector<8x128xf32>
    %38 = arith.maximumf %36, %37 : vector<8x128xf32>
    %39 = arith.truncf %38 : vector<8x128xf32> to vector<8x128xbf16>
    %c0_50 = arith.constant 0 : index
    %c1 = arith.constant 1 : index
    %c0_51 = arith.constant 0 : index
    %c0_52 = arith.constant 0 : index
    %40 = vector.load %arg10[%c0_50, %c1, %c0_51, %c0_52] : memref<3x10x128x128xbf16, #tpu.memory_space<vmem>>, vector<1x1x128x128xbf16>
    %41 = vector.shape_cast %40 : vector<1x1x128x128xbf16> to vector<128x128xbf16>
    %cst_53 = arith.constant dense<0.000000e+00> : vector<8x128xf32>
    %42 = tpu.matmul %39, %41, %cst_53 {dimension_numbers = #tpu.dot_dimension_numbers<[1], [0], [0], [1], [0, 0, 1, 1], [], []>} : vector<8x128xbf16>, vector<128x128xbf16>, vector<8x128xf32> -> vector<8x128xf32>
    %c0_54 = arith.constant 0 : index
    %c1_55 = arith.constant 1 : index
    %c0_56 = arith.constant 0 : index
    %c0_57 = arith.constant 0 : index
    %43 = vector.load %arg4[%c0_54, %c1_55, %c0_56, %c0_57] : memref<3x10x1x128xf32, #tpu.memory_space<vmem>>, vector<1x1x1x128xf32>
    %44 = vector.shape_cast %43 : vector<1x1x1x128xf32> to vector<1x128xf32>
    %45 = vector.broadcast %44 : vector<1x128xf32> to vector<8x128xf32>
    %46 = arith.addf %42, %45 : vector<8x128xf32>
    %cst_58 = arith.constant 0.000000e+00 : f32
    %47 = vector.broadcast %cst_58 : f32 to vector<8x128xf32>
    %48 = arith.maximumf %46, %47 : vector<8x128xf32>
    %49 = arith.truncf %48 : vector<8x128xf32> to vector<8x128xbf16>
    %c0_59 = arith.constant 0 : index
    %c2 = arith.constant 2 : index
    %c0_60 = arith.constant 0 : index
    %c0_61 = arith.constant 0 : index
    %50 = vector.load %arg10[%c0_59, %c2, %c0_60, %c0_61] : memref<3x10x128x128xbf16, #tpu.memory_space<vmem>>, vector<1x1x128x128xbf16>
    %51 = vector.shape_cast %50 : vector<1x1x128x128xbf16> to vector<128x128xbf16>
    %cst_62 = arith.constant dense<0.000000e+00> : vector<8x128xf32>
    %52 = tpu.matmul %49, %51, %cst_62 {dimension_numbers = #tpu.dot_dimension_numbers<[1], [0], [0], [1], [0, 0, 1, 1], [], []>} : vector<8x128xbf16>, vector<128x128xbf16>, vector<8x128xf32> -> vector<8x128xf32>
    %c0_63 = arith.constant 0 : index
    %c2_64 = arith.constant 2 : index
    %c0_65 = arith.constant 0 : index
    %c0_66 = arith.constant 0 : index
    %53 = vector.load %arg4[%c0_63, %c2_64, %c0_65, %c0_66] : memref<3x10x1x128xf32, #tpu.memory_space<vmem>>, vector<1x1x1x128xf32>
    %54 = vector.shape_cast %53 : vector<1x1x1x128xf32> to vector<1x128xf32>
    %55 = vector.broadcast %54 : vector<1x128xf32> to vector<8x128xf32>
    %56 = arith.addf %52, %55 : vector<8x128xf32>
    %cst_67 = arith.constant 0.000000e+00 : f32
    %57 = vector.broadcast %cst_67 : f32 to vector<8x128xf32>
    %58 = arith.maximumf %56, %57 : vector<8x128xf32>
    %59 = arith.truncf %58 : vector<8x128xf32> to vector<8x128xbf16>
    %c0_68 = arith.constant 0 : index
    %c3 = arith.constant 3 : index
    %c0_69 = arith.constant 0 : index
    %c0_70 = arith.constant 0 : index
    %60 = vector.load %arg10[%c0_68, %c3, %c0_69, %c0_70] : memref<3x10x128x128xbf16, #tpu.memory_space<vmem>>, vector<1x1x128x128xbf16>
    %61 = vector.shape_cast %60 : vector<1x1x128x128xbf16> to vector<128x128xbf16>
    %cst_71 = arith.constant dense<0.000000e+00> : vector<8x128xf32>
    %62 = tpu.matmul %59, %61, %cst_71 {dimension_numbers = #tpu.dot_dimension_numbers<[1], [0], [0], [1], [0, 0, 1, 1], [], []>} : vector<8x128xbf16>, vector<128x128xbf16>, vector<8x128xf32> -> vector<8x128xf32>
    %c0_72 = arith.constant 0 : index
    %c3_73 = arith.constant 3 : index
    %c0_74 = arith.constant 0 : index
    %c0_75 = arith.constant 0 : index
    %63 = vector.load %arg4[%c0_72, %c3_73, %c0_74, %c0_75] : memref<3x10x1x128xf32, #tpu.memory_space<vmem>>, vector<1x1x1x128xf32>
    %64 = vector.shape_cast %63 : vector<1x1x1x128xf32> to vector<1x128xf32>
    %65 = vector.broadcast %64 : vector<1x128xf32> to vector<8x128xf32>
    %66 = arith.addf %62, %65 : vector<8x128xf32>
    %cst_76 = arith.constant 0.000000e+00 : f32
    %67 = vector.broadcast %cst_76 : f32 to vector<8x128xf32>
    %68 = arith.maximumf %66, %67 : vector<8x128xf32>
    %69 = arith.truncf %68 : vector<8x128xf32> to vector<8x128xbf16>
    %c0_77 = arith.constant 0 : index
    %c4 = arith.constant 4 : index
    %c0_78 = arith.constant 0 : index
    %c0_79 = arith.constant 0 : index
    %70 = vector.load %arg10[%c0_77, %c4, %c0_78, %c0_79] : memref<3x10x128x128xbf16, #tpu.memory_space<vmem>>, vector<1x1x128x128xbf16>
    %71 = vector.shape_cast %70 : vector<1x1x128x128xbf16> to vector<128x128xbf16>
    %cst_80 = arith.constant dense<0.000000e+00> : vector<8x128xf32>
    %72 = tpu.matmul %69, %71, %cst_80 {dimension_numbers = #tpu.dot_dimension_numbers<[1], [0], [0], [1], [0, 0, 1, 1], [], []>} : vector<8x128xbf16>, vector<128x128xbf16>, vector<8x128xf32> -> vector<8x128xf32>
    %c0_81 = arith.constant 0 : index
    %c4_82 = arith.constant 4 : index
    %c0_83 = arith.constant 0 : index
    %c0_84 = arith.constant 0 : index
    %73 = vector.load %arg4[%c0_81, %c4_82, %c0_83, %c0_84] : memref<3x10x1x128xf32, #tpu.memory_space<vmem>>, vector<1x1x1x128xf32>
    %74 = vector.shape_cast %73 : vector<1x1x1x128xf32> to vector<1x128xf32>
    %75 = vector.broadcast %74 : vector<1x128xf32> to vector<8x128xf32>
    %76 = arith.addf %72, %75 : vector<8x128xf32>
    %cst_85 = arith.constant 0.000000e+00 : f32
    %77 = vector.broadcast %cst_85 : f32 to vector<8x128xf32>
    %78 = arith.maximumf %76, %77 : vector<8x128xf32>
    %79 = arith.truncf %78 : vector<8x128xf32> to vector<8x128xbf16>
    %c0_86 = arith.constant 0 : index
    %c5 = arith.constant 5 : index
    %c0_87 = arith.constant 0 : index
    %c0_88 = arith.constant 0 : index
    %80 = vector.load %arg10[%c0_86, %c5, %c0_87, %c0_88] : memref<3x10x128x128xbf16, #tpu.memory_space<vmem>>, vector<1x1x128x128xbf16>
    %81 = vector.shape_cast %80 : vector<1x1x128x128xbf16> to vector<128x128xbf16>
    %cst_89 = arith.constant dense<0.000000e+00> : vector<8x128xf32>
    %82 = tpu.matmul %79, %81, %cst_89 {dimension_numbers = #tpu.dot_dimension_numbers<[1], [0], [0], [1], [0, 0, 1, 1], [], []>} : vector<8x128xbf16>, vector<128x128xbf16>, vector<8x128xf32> -> vector<8x128xf32>
    %c0_90 = arith.constant 0 : index
    %c5_91 = arith.constant 5 : index
    %c0_92 = arith.constant 0 : index
    %c0_93 = arith.constant 0 : index
    %83 = vector.load %arg4[%c0_90, %c5_91, %c0_92, %c0_93] : memref<3x10x1x128xf32, #tpu.memory_space<vmem>>, vector<1x1x1x128xf32>
    %84 = vector.shape_cast %83 : vector<1x1x1x128xf32> to vector<1x128xf32>
    %85 = vector.broadcast %84 : vector<1x128xf32> to vector<8x128xf32>
    %86 = arith.addf %82, %85 : vector<8x128xf32>
    %cst_94 = arith.constant 0.000000e+00 : f32
    %87 = vector.broadcast %cst_94 : f32 to vector<8x128xf32>
    %88 = arith.maximumf %86, %87 : vector<8x128xf32>
    %89 = arith.truncf %88 : vector<8x128xf32> to vector<8x128xbf16>
    %c0_95 = arith.constant 0 : index
    %c6 = arith.constant 6 : index
    %c0_96 = arith.constant 0 : index
    %c0_97 = arith.constant 0 : index
    %90 = vector.load %arg10[%c0_95, %c6, %c0_96, %c0_97] : memref<3x10x128x128xbf16, #tpu.memory_space<vmem>>, vector<1x1x128x128xbf16>
    %91 = vector.shape_cast %90 : vector<1x1x128x128xbf16> to vector<128x128xbf16>
    %cst_98 = arith.constant dense<0.000000e+00> : vector<8x128xf32>
    %92 = tpu.matmul %89, %91, %cst_98 {dimension_numbers = #tpu.dot_dimension_numbers<[1], [0], [0], [1], [0, 0, 1, 1], [], []>} : vector<8x128xbf16>, vector<128x128xbf16>, vector<8x128xf32> -> vector<8x128xf32>
    %c0_99 = arith.constant 0 : index
    %c6_100 = arith.constant 6 : index
    %c0_101 = arith.constant 0 : index
    %c0_102 = arith.constant 0 : index
    %93 = vector.load %arg4[%c0_99, %c6_100, %c0_101, %c0_102] : memref<3x10x1x128xf32, #tpu.memory_space<vmem>>, vector<1x1x1x128xf32>
    %94 = vector.shape_cast %93 : vector<1x1x1x128xf32> to vector<1x128xf32>
    %95 = vector.broadcast %94 : vector<1x128xf32> to vector<8x128xf32>
    %96 = arith.addf %92, %95 : vector<8x128xf32>
    %cst_103 = arith.constant 0.000000e+00 : f32
    %97 = vector.broadcast %cst_103 : f32 to vector<8x128xf32>
    %98 = arith.maximumf %96, %97 : vector<8x128xf32>
    %99 = arith.truncf %98 : vector<8x128xf32> to vector<8x128xbf16>
    %c0_104 = arith.constant 0 : index
    %c7 = arith.constant 7 : index
    %c0_105 = arith.constant 0 : index
    %c0_106 = arith.constant 0 : index
    %100 = vector.load %arg10[%c0_104, %c7, %c0_105, %c0_106] : memref<3x10x128x128xbf16, #tpu.memory_space<vmem>>, vector<1x1x128x128xbf16>
    %101 = vector.shape_cast %100 : vector<1x1x128x128xbf16> to vector<128x128xbf16>
    %cst_107 = arith.constant dense<0.000000e+00> : vector<8x128xf32>
    %102 = tpu.matmul %99, %101, %cst_107 {dimension_numbers = #tpu.dot_dimension_numbers<[1], [0], [0], [1], [0, 0, 1, 1], [], []>} : vector<8x128xbf16>, vector<128x128xbf16>, vector<8x128xf32> -> vector<8x128xf32>
    %c0_108 = arith.constant 0 : index
    %c7_109 = arith.constant 7 : index
    %c0_110 = arith.constant 0 : index
    %c0_111 = arith.constant 0 : index
    %103 = vector.load %arg4[%c0_108, %c7_109, %c0_110, %c0_111] : memref<3x10x1x128xf32, #tpu.memory_space<vmem>>, vector<1x1x1x128xf32>
    %104 = vector.shape_cast %103 : vector<1x1x1x128xf32> to vector<1x128xf32>
    %105 = vector.broadcast %104 : vector<1x128xf32> to vector<8x128xf32>
    %106 = arith.addf %102, %105 : vector<8x128xf32>
    %cst_112 = arith.constant 0.000000e+00 : f32
    %107 = vector.broadcast %cst_112 : f32 to vector<8x128xf32>
    %108 = arith.maximumf %106, %107 : vector<8x128xf32>
    %109 = arith.truncf %108 : vector<8x128xf32> to vector<8x128xbf16>
    %c0_113 = arith.constant 0 : index
    %c8 = arith.constant 8 : index
    %c0_114 = arith.constant 0 : index
    %c0_115 = arith.constant 0 : index
    %110 = vector.load %arg10[%c0_113, %c8, %c0_114, %c0_115] : memref<3x10x128x128xbf16, #tpu.memory_space<vmem>>, vector<1x1x128x128xbf16>
    %111 = vector.shape_cast %110 : vector<1x1x128x128xbf16> to vector<128x128xbf16>
    %cst_116 = arith.constant dense<0.000000e+00> : vector<8x128xf32>
    %112 = tpu.matmul %109, %111, %cst_116 {dimension_numbers = #tpu.dot_dimension_numbers<[1], [0], [0], [1], [0, 0, 1, 1], [], []>} : vector<8x128xbf16>, vector<128x128xbf16>, vector<8x128xf32> -> vector<8x128xf32>
    %c0_117 = arith.constant 0 : index
    %c8_118 = arith.constant 8 : index
    %c0_119 = arith.constant 0 : index
    %c0_120 = arith.constant 0 : index
    %113 = vector.load %arg4[%c0_117, %c8_118, %c0_119, %c0_120] : memref<3x10x1x128xf32, #tpu.memory_space<vmem>>, vector<1x1x1x128xf32>
    %114 = vector.shape_cast %113 : vector<1x1x1x128xf32> to vector<1x128xf32>
    %115 = vector.broadcast %114 : vector<1x128xf32> to vector<8x128xf32>
    %116 = arith.addf %112, %115 : vector<8x128xf32>
    %cst_121 = arith.constant 0.000000e+00 : f32
    %117 = vector.broadcast %cst_121 : f32 to vector<8x128xf32>
    %118 = arith.maximumf %116, %117 : vector<8x128xf32>
    %119 = arith.truncf %118 : vector<8x128xf32> to vector<8x128xbf16>
    %c0_122 = arith.constant 0 : index
    %c9 = arith.constant 9 : index
    %c0_123 = arith.constant 0 : index
    %c0_124 = arith.constant 0 : index
    %120 = vector.load %arg10[%c0_122, %c9, %c0_123, %c0_124] : memref<3x10x128x128xbf16, #tpu.memory_space<vmem>>, vector<1x1x128x128xbf16>
    %121 = vector.shape_cast %120 : vector<1x1x128x128xbf16> to vector<128x128xbf16>
    %cst_125 = arith.constant dense<0.000000e+00> : vector<8x128xf32>
    %122 = tpu.matmul %119, %121, %cst_125 {dimension_numbers = #tpu.dot_dimension_numbers<[1], [0], [0], [1], [0, 0, 1, 1], [], []>} : vector<8x128xbf16>, vector<128x128xbf16>, vector<8x128xf32> -> vector<8x128xf32>
    %c0_126 = arith.constant 0 : index
    %c9_127 = arith.constant 9 : index
    %c0_128 = arith.constant 0 : index
    %c0_129 = arith.constant 0 : index
    %123 = vector.load %arg4[%c0_126, %c9_127, %c0_128, %c0_129] : memref<3x10x1x128xf32, #tpu.memory_space<vmem>>, vector<1x1x1x128xf32>
    %124 = vector.shape_cast %123 : vector<1x1x1x128xf32> to vector<1x128xf32>
    %125 = vector.broadcast %124 : vector<1x128xf32> to vector<8x128xf32>
    %126 = arith.addf %122, %125 : vector<8x128xf32>
    %cst_130 = arith.constant 0.000000e+00 : f32
    %127 = vector.broadcast %cst_130 : f32 to vector<8x128xf32>
    %128 = arith.maximumf %126, %127 : vector<8x128xf32>
    %129 = arith.truncf %128 : vector<8x128xf32> to vector<8x128xbf16>
    %cst_131 = arith.constant 0.000000e+00 : bf16
    %130 = vector.broadcast %cst_131 : bf16 to vector<8x128xbf16>
    %c0_132 = arith.constant 0 : index
    %c0_133 = arith.constant 0 : index
    %131 = vector.load %arg11[%c0_132, %c0_133] : memref<8x128xbf16, #tpu.memory_space<vmem>>, vector<8x128xbf16>
    tpu.vector_store %arg11[%c0_132, %c0_133], %130 {strides = array<i32>} : memref<8x128xbf16, #tpu.memory_space<vmem>>, vector<8x128xbf16>,
    %c0_134 = arith.constant 0 : index
    %c0_135 = arith.constant 0 : index
    %132 = vector.load %arg1[%c0_134, %c0_135] : memref<8x24xf32, #tpu.memory_space<vmem>>, vector<8x24xf32>
    %133 = arith.truncf %132 : vector<8x24xf32> to vector<8x24xbf16>
    %c0_136 = arith.constant 0 : index
    %c0_137 = arith.constant 0 : index
    %134 = vector.load %arg11[%c0_136, %c0_137] : memref<8x128xbf16, #tpu.memory_space<vmem>>, vector<8x24xbf16>
    tpu.vector_store %arg11[%c0_136, %c0_137], %133 {strides = array<i32>} : memref<8x128xbf16, #tpu.memory_space<vmem>>, vector<8x24xbf16>,
    %c0_138 = arith.constant 0 : index
    %c0_139 = arith.constant 0 : index
    %135 = vector.load %arg11[%c0_138, %c0_139] : memref<8x128xbf16, #tpu.memory_space<vmem>>, vector<8x128xbf16>
    %c1_i32_140 = arith.constant 1 : i32
    %c1_i32_141 = arith.constant 1 : i32
    %c1_i32_142 = arith.constant 1 : i32
    %c0_i32_143 = arith.constant 0 : i32
    %c0_i32_144 = arith.constant 0 : i32
    %c0_i32_145 = arith.constant 0 : i32
    %136 = tpu.memref_slice %arg3[%c1_i32_140, %c0_i32_143, %c0_i32_144, %c0_i32_145] : memref<3x10x128x128xbf16, #tpu.memory_space<any>> -> memref<1x10x128x128xbf16, #tpu.memory_space<any>>
    %137 = tpu.memref_squeeze %136 : memref<1x10x128x128xbf16, #tpu.memory_space<any>> -> memref<10x128x128xbf16, #tpu.memory_space<any>>
    %c0_i32_146 = arith.constant 0 : i32
    %c0_i32_147 = arith.constant 0 : i32
    %c0_i32_148 = arith.constant 0 : i32
    %138 = tpu.memref_slice %arg10[%c1_i32_141, %c0_i32_146, %c0_i32_147, %c0_i32_148] : memref<3x10x128x128xbf16, #tpu.memory_space<vmem>> -> memref<1x10x128x128xbf16, #tpu.memory_space<vmem>>
    %139 = tpu.memref_squeeze %138 : memref<1x10x128x128xbf16, #tpu.memory_space<vmem>> -> memref<10x128x128xbf16, #tpu.memory_space<vmem>>
    %140 = tpu.memref_slice %arg12[%c1_i32_142] : memref<3x!tpu.dma_semaphore, #tpu.memory_space<semaphore_mem>> -> memref<1x!tpu.dma_semaphore, #tpu.memory_space<semaphore_mem>>
    %141 = tpu.memref_squeeze %140 : memref<1x!tpu.dma_semaphore, #tpu.memory_space<semaphore_mem>> -> memref<!tpu.dma_semaphore, #tpu.memory_space<semaphore_mem>>
    tpu.wait_dma2 semaphore(%141 : memref<!tpu.dma_semaphore, #tpu.memory_space<semaphore_mem>>) src(%137 : memref<10x128x128xbf16, #tpu.memory_space<any>>) dst(%139 : memref<10x128x128xbf16, #tpu.memory_space<vmem>>)
    %c1_149 = arith.constant 1 : index
    %c0_150 = arith.constant 0 : index
    %c0_151 = arith.constant 0 : index
    %c0_152 = arith.constant 0 : index
    %142 = vector.load %arg10[%c1_149, %c0_150, %c0_151, %c0_152] : memref<3x10x128x128xbf16, #tpu.memory_space<vmem>>, vector<1x1x128x128xbf16>
    %143 = vector.shape_cast %142 : vector<1x1x128x128xbf16> to vector<128x128xbf16>
    %cst_153 = arith.constant dense<0.000000e+00> : vector<8x128xf32>
    %144 = tpu.matmul %135, %143, %cst_153 {dimension_numbers = #tpu.dot_dimension_numbers<[1], [0], [0], [1], [0, 0, 1, 1], [], []>} : vector<8x128xbf16>, vector<128x128xbf16>, vector<8x128xf32> -> vector<8x128xf32>
    %c1_154 = arith.constant 1 : index
    %c0_155 = arith.constant 0 : index
    %c0_156 = arith.constant 0 : index
    %c0_157 = arith.constant 0 : index
    %145 = vector.load %arg4[%c1_154, %c0_155, %c0_156, %c0_157] : memref<3x10x1x128xf32, #tpu.memory_space<vmem>>, vector<1x1x1x128xf32>
    %146 = vector.shape_cast %145 : vector<1x1x1x128xf32> to vector<1x128xf32>
    %147 = vector.broadcast %146 : vector<1x128xf32> to vector<8x128xf32>
    %148 = arith.addf %144, %147 : vector<8x128xf32>
    %cst_158 = arith.constant 0.000000e+00 : f32
    %149 = vector.broadcast %cst_158 : f32 to vector<8x128xf32>
    %150 = arith.maximumf %148, %149 : vector<8x128xf32>
    %151 = arith.truncf %150 : vector<8x128xf32> to vector<8x128xbf16>
    %c1_159 = arith.constant 1 : index
    %c1_160 = arith.constant 1 : index
    %c0_161 = arith.constant 0 : index
    %c0_162 = arith.constant 0 : index
    %152 = vector.load %arg10[%c1_159, %c1_160, %c0_161, %c0_162] : memref<3x10x128x128xbf16, #tpu.memory_space<vmem>>, vector<1x1x128x128xbf16>
    %153 = vector.shape_cast %152 : vector<1x1x128x128xbf16> to vector<128x128xbf16>
    %cst_163 = arith.constant dense<0.000000e+00> : vector<8x128xf32>
    %154 = tpu.matmul %151, %153, %cst_163 {dimension_numbers = #tpu.dot_dimension_numbers<[1], [0], [0], [1], [0, 0, 1, 1], [], []>} : vector<8x128xbf16>, vector<128x128xbf16>, vector<8x128xf32> -> vector<8x128xf32>
    %c1_164 = arith.constant 1 : index
    %c1_165 = arith.constant 1 : index
    %c0_166 = arith.constant 0 : index
    %c0_167 = arith.constant 0 : index
    %155 = vector.load %arg4[%c1_164, %c1_165, %c0_166, %c0_167] : memref<3x10x1x128xf32, #tpu.memory_space<vmem>>, vector<1x1x1x128xf32>
    %156 = vector.shape_cast %155 : vector<1x1x1x128xf32> to vector<1x128xf32>
    %157 = vector.broadcast %156 : vector<1x128xf32> to vector<8x128xf32>
    %158 = arith.addf %154, %157 : vector<8x128xf32>
    %cst_168 = arith.constant 0.000000e+00 : f32
    %159 = vector.broadcast %cst_168 : f32 to vector<8x128xf32>
    %160 = arith.maximumf %158, %159 : vector<8x128xf32>
    %161 = arith.truncf %160 : vector<8x128xf32> to vector<8x128xbf16>
    %c1_169 = arith.constant 1 : index
    %c2_170 = arith.constant 2 : index
    %c0_171 = arith.constant 0 : index
    %c0_172 = arith.constant 0 : index
    %162 = vector.load %arg10[%c1_169, %c2_170, %c0_171, %c0_172] : memref<3x10x128x128xbf16, #tpu.memory_space<vmem>>, vector<1x1x128x128xbf16>
    %163 = vector.shape_cast %162 : vector<1x1x128x128xbf16> to vector<128x128xbf16>
    %cst_173 = arith.constant dense<0.000000e+00> : vector<8x128xf32>
    %164 = tpu.matmul %161, %163, %cst_173 {dimension_numbers = #tpu.dot_dimension_numbers<[1], [0], [0], [1], [0, 0, 1, 1], [], []>} : vector<8x128xbf16>, vector<128x128xbf16>, vector<8x128xf32> -> vector<8x128xf32>
    %c1_174 = arith.constant 1 : index
    %c2_175 = arith.constant 2 : index
    %c0_176 = arith.constant 0 : index
    %c0_177 = arith.constant 0 : index
    %165 = vector.load %arg4[%c1_174, %c2_175, %c0_176, %c0_177] : memref<3x10x1x128xf32, #tpu.memory_space<vmem>>, vector<1x1x1x128xf32>
    %166 = vector.shape_cast %165 : vector<1x1x1x128xf32> to vector<1x128xf32>
    %167 = vector.broadcast %166 : vector<1x128xf32> to vector<8x128xf32>
    %168 = arith.addf %164, %167 : vector<8x128xf32>
    %cst_178 = arith.constant 0.000000e+00 : f32
    %169 = vector.broadcast %cst_178 : f32 to vector<8x128xf32>
    %170 = arith.maximumf %168, %169 : vector<8x128xf32>
    %171 = arith.truncf %170 : vector<8x128xf32> to vector<8x128xbf16>
    %c1_179 = arith.constant 1 : index
    %c3_180 = arith.constant 3 : index
    %c0_181 = arith.constant 0 : index
    %c0_182 = arith.constant 0 : index
    %172 = vector.load %arg10[%c1_179, %c3_180, %c0_181, %c0_182] : memref<3x10x128x128xbf16, #tpu.memory_space<vmem>>, vector<1x1x128x128xbf16>
    %173 = vector.shape_cast %172 : vector<1x1x128x128xbf16> to vector<128x128xbf16>
    %cst_183 = arith.constant dense<0.000000e+00> : vector<8x128xf32>
    %174 = tpu.matmul %171, %173, %cst_183 {dimension_numbers = #tpu.dot_dimension_numbers<[1], [0], [0], [1], [0, 0, 1, 1], [], []>} : vector<8x128xbf16>, vector<128x128xbf16>, vector<8x128xf32> -> vector<8x128xf32>
    %c1_184 = arith.constant 1 : index
    %c3_185 = arith.constant 3 : index
    %c0_186 = arith.constant 0 : index
    %c0_187 = arith.constant 0 : index
    %175 = vector.load %arg4[%c1_184, %c3_185, %c0_186, %c0_187] : memref<3x10x1x128xf32, #tpu.memory_space<vmem>>, vector<1x1x1x128xf32>
    %176 = vector.shape_cast %175 : vector<1x1x1x128xf32> to vector<1x128xf32>
    %177 = vector.broadcast %176 : vector<1x128xf32> to vector<8x128xf32>
    %178 = arith.addf %174, %177 : vector<8x128xf32>
    %cst_188 = arith.constant 0.000000e+00 : f32
    %179 = vector.broadcast %cst_188 : f32 to vector<8x128xf32>
    %180 = arith.maximumf %178, %179 : vector<8x128xf32>
    %181 = arith.truncf %180 : vector<8x128xf32> to vector<8x128xbf16>
    %c1_189 = arith.constant 1 : index
    %c4_190 = arith.constant 4 : index
    %c0_191 = arith.constant 0 : index
    %c0_192 = arith.constant 0 : index
    %182 = vector.load %arg10[%c1_189, %c4_190, %c0_191, %c0_192] : memref<3x10x128x128xbf16, #tpu.memory_space<vmem>>, vector<1x1x128x128xbf16>
    %183 = vector.shape_cast %182 : vector<1x1x128x128xbf16> to vector<128x128xbf16>
    %cst_193 = arith.constant dense<0.000000e+00> : vector<8x128xf32>
    %184 = tpu.matmul %181, %183, %cst_193 {dimension_numbers = #tpu.dot_dimension_numbers<[1], [0], [0], [1], [0, 0, 1, 1], [], []>} : vector<8x128xbf16>, vector<128x128xbf16>, vector<8x128xf32> -> vector<8x128xf32>
    %c1_194 = arith.constant 1 : index
    %c4_195 = arith.constant 4 : index
    %c0_196 = arith.constant 0 : index
    %c0_197 = arith.constant 0 : index
    %185 = vector.load %arg4[%c1_194, %c4_195, %c0_196, %c0_197] : memref<3x10x1x128xf32, #tpu.memory_space<vmem>>, vector<1x1x1x128xf32>
    %186 = vector.shape_cast %185 : vector<1x1x1x128xf32> to vector<1x128xf32>
    %187 = vector.broadcast %186 : vector<1x128xf32> to vector<8x128xf32>
    %188 = arith.addf %184, %187 : vector<8x128xf32>
    %cst_198 = arith.constant 0.000000e+00 : f32
    %189 = vector.broadcast %cst_198 : f32 to vector<8x128xf32>
    %190 = arith.maximumf %188, %189 : vector<8x128xf32>
    %191 = arith.truncf %190 : vector<8x128xf32> to vector<8x128xbf16>
    %c1_199 = arith.constant 1 : index
    %c5_200 = arith.constant 5 : index
    %c0_201 = arith.constant 0 : index
    %c0_202 = arith.constant 0 : index
    %192 = vector.load %arg10[%c1_199, %c5_200, %c0_201, %c0_202] : memref<3x10x128x128xbf16, #tpu.memory_space<vmem>>, vector<1x1x128x128xbf16>
    %193 = vector.shape_cast %192 : vector<1x1x128x128xbf16> to vector<128x128xbf16>
    %cst_203 = arith.constant dense<0.000000e+00> : vector<8x128xf32>
    %194 = tpu.matmul %191, %193, %cst_203 {dimension_numbers = #tpu.dot_dimension_numbers<[1], [0], [0], [1], [0, 0, 1, 1], [], []>} : vector<8x128xbf16>, vector<128x128xbf16>, vector<8x128xf32> -> vector<8x128xf32>
    %c1_204 = arith.constant 1 : index
    %c5_205 = arith.constant 5 : index
    %c0_206 = arith.constant 0 : index
    %c0_207 = arith.constant 0 : index
    %195 = vector.load %arg4[%c1_204, %c5_205, %c0_206, %c0_207] : memref<3x10x1x128xf32, #tpu.memory_space<vmem>>, vector<1x1x1x128xf32>
    %196 = vector.shape_cast %195 : vector<1x1x1x128xf32> to vector<1x128xf32>
    %197 = vector.broadcast %196 : vector<1x128xf32> to vector<8x128xf32>
    %198 = arith.addf %194, %197 : vector<8x128xf32>
    %cst_208 = arith.constant 0.000000e+00 : f32
    %199 = vector.broadcast %cst_208 : f32 to vector<8x128xf32>
    %200 = arith.maximumf %198, %199 : vector<8x128xf32>
    %201 = arith.truncf %200 : vector<8x128xf32> to vector<8x128xbf16>
    %c1_209 = arith.constant 1 : index
    %c6_210 = arith.constant 6 : index
    %c0_211 = arith.constant 0 : index
    %c0_212 = arith.constant 0 : index
    %202 = vector.load %arg10[%c1_209, %c6_210, %c0_211, %c0_212] : memref<3x10x128x128xbf16, #tpu.memory_space<vmem>>, vector<1x1x128x128xbf16>
    %203 = vector.shape_cast %202 : vector<1x1x128x128xbf16> to vector<128x128xbf16>
    %cst_213 = arith.constant dense<0.000000e+00> : vector<8x128xf32>
    %204 = tpu.matmul %201, %203, %cst_213 {dimension_numbers = #tpu.dot_dimension_numbers<[1], [0], [0], [1], [0, 0, 1, 1], [], []>} : vector<8x128xbf16>, vector<128x128xbf16>, vector<8x128xf32> -> vector<8x128xf32>
    %c1_214 = arith.constant 1 : index
    %c6_215 = arith.constant 6 : index
    %c0_216 = arith.constant 0 : index
    %c0_217 = arith.constant 0 : index
    %205 = vector.load %arg4[%c1_214, %c6_215, %c0_216, %c0_217] : memref<3x10x1x128xf32, #tpu.memory_space<vmem>>, vector<1x1x1x128xf32>
    %206 = vector.shape_cast %205 : vector<1x1x1x128xf32> to vector<1x128xf32>
    %207 = vector.broadcast %206 : vector<1x128xf32> to vector<8x128xf32>
    %208 = arith.addf %204, %207 : vector<8x128xf32>
    %cst_218 = arith.constant 0.000000e+00 : f32
    %209 = vector.broadcast %cst_218 : f32 to vector<8x128xf32>
    %210 = arith.maximumf %208, %209 : vector<8x128xf32>
    %211 = arith.truncf %210 : vector<8x128xf32> to vector<8x128xbf16>
    %c1_219 = arith.constant 1 : index
    %c7_220 = arith.constant 7 : index
    %c0_221 = arith.constant 0 : index
    %c0_222 = arith.constant 0 : index
    %212 = vector.load %arg10[%c1_219, %c7_220, %c0_221, %c0_222] : memref<3x10x128x128xbf16, #tpu.memory_space<vmem>>, vector<1x1x128x128xbf16>
    %213 = vector.shape_cast %212 : vector<1x1x128x128xbf16> to vector<128x128xbf16>
    %cst_223 = arith.constant dense<0.000000e+00> : vector<8x128xf32>
    %214 = tpu.matmul %211, %213, %cst_223 {dimension_numbers = #tpu.dot_dimension_numbers<[1], [0], [0], [1], [0, 0, 1, 1], [], []>} : vector<8x128xbf16>, vector<128x128xbf16>, vector<8x128xf32> -> vector<8x128xf32>
    %c1_224 = arith.constant 1 : index
    %c7_225 = arith.constant 7 : index
    %c0_226 = arith.constant 0 : index
    %c0_227 = arith.constant 0 : index
    %215 = vector.load %arg4[%c1_224, %c7_225, %c0_226, %c0_227] : memref<3x10x1x128xf32, #tpu.memory_space<vmem>>, vector<1x1x1x128xf32>
    %216 = vector.shape_cast %215 : vector<1x1x1x128xf32> to vector<1x128xf32>
    %217 = vector.broadcast %216 : vector<1x128xf32> to vector<8x128xf32>
    %218 = arith.addf %214, %217 : vector<8x128xf32>
    %cst_228 = arith.constant 0.000000e+00 : f32
    %219 = vector.broadcast %cst_228 : f32 to vector<8x128xf32>
    %220 = arith.maximumf %218, %219 : vector<8x128xf32>
    %221 = arith.truncf %220 : vector<8x128xf32> to vector<8x128xbf16>
    %c1_229 = arith.constant 1 : index
    %c8_230 = arith.constant 8 : index
    %c0_231 = arith.constant 0 : index
    %c0_232 = arith.constant 0 : index
    %222 = vector.load %arg10[%c1_229, %c8_230, %c0_231, %c0_232] : memref<3x10x128x128xbf16, #tpu.memory_space<vmem>>, vector<1x1x128x128xbf16>
    %223 = vector.shape_cast %222 : vector<1x1x128x128xbf16> to vector<128x128xbf16>
    %cst_233 = arith.constant dense<0.000000e+00> : vector<8x128xf32>
    %224 = tpu.matmul %221, %223, %cst_233 {dimension_numbers = #tpu.dot_dimension_numbers<[1], [0], [0], [1], [0, 0, 1, 1], [], []>} : vector<8x128xbf16>, vector<128x128xbf16>, vector<8x128xf32> -> vector<8x128xf32>
    %c1_234 = arith.constant 1 : index
    %c8_235 = arith.constant 8 : index
    %c0_236 = arith.constant 0 : index
    %c0_237 = arith.constant 0 : index
    %225 = vector.load %arg4[%c1_234, %c8_235, %c0_236, %c0_237] : memref<3x10x1x128xf32, #tpu.memory_space<vmem>>, vector<1x1x1x128xf32>
    %226 = vector.shape_cast %225 : vector<1x1x1x128xf32> to vector<1x128xf32>
    %227 = vector.broadcast %226 : vector<1x128xf32> to vector<8x128xf32>
    %228 = arith.addf %224, %227 : vector<8x128xf32>
    %cst_238 = arith.constant 0.000000e+00 : f32
    %229 = vector.broadcast %cst_238 : f32 to vector<8x128xf32>
    %230 = arith.maximumf %228, %229 : vector<8x128xf32>
    %231 = arith.truncf %230 : vector<8x128xf32> to vector<8x128xbf16>
    %c1_239 = arith.constant 1 : index
    %c9_240 = arith.constant 9 : index
    %c0_241 = arith.constant 0 : index
    %c0_242 = arith.constant 0 : index
    %232 = vector.load %arg10[%c1_239, %c9_240, %c0_241, %c0_242] : memref<3x10x128x128xbf16, #tpu.memory_space<vmem>>, vector<1x1x128x128xbf16>
    %233 = vector.shape_cast %232 : vector<1x1x128x128xbf16> to vector<128x128xbf16>
    %cst_243 = arith.constant dense<0.000000e+00> : vector<8x128xf32>
    %234 = tpu.matmul %231, %233, %cst_243 {dimension_numbers = #tpu.dot_dimension_numbers<[1], [0], [0], [1], [0, 0, 1, 1], [], []>} : vector<8x128xbf16>, vector<128x128xbf16>, vector<8x128xf32> -> vector<8x128xf32>
    %c1_244 = arith.constant 1 : index
    %c9_245 = arith.constant 9 : index
    %c0_246 = arith.constant 0 : index
    %c0_247 = arith.constant 0 : index
    %235 = vector.load %arg4[%c1_244, %c9_245, %c0_246, %c0_247] : memref<3x10x1x128xf32, #tpu.memory_space<vmem>>, vector<1x1x1x128xf32>
    %236 = vector.shape_cast %235 : vector<1x1x1x128xf32> to vector<1x128xf32>
    %237 = vector.broadcast %236 : vector<1x128xf32> to vector<8x128xf32>
    %238 = arith.addf %234, %237 : vector<8x128xf32>
    %cst_248 = arith.constant 0.000000e+00 : f32
    %239 = vector.broadcast %cst_248 : f32 to vector<8x128xf32>
    %240 = arith.maximumf %238, %239 : vector<8x128xf32>
    %241 = arith.truncf %240 : vector<8x128xf32> to vector<8x128xbf16>
    %cst_249 = arith.constant 0.000000e+00 : bf16
    %242 = vector.broadcast %cst_249 : bf16 to vector<8x128xbf16>
    %c0_250 = arith.constant 0 : index
    %c0_251 = arith.constant 0 : index
    %243 = vector.load %arg11[%c0_250, %c0_251] : memref<8x128xbf16, #tpu.memory_space<vmem>>, vector<8x128xbf16>
    tpu.vector_store %arg11[%c0_250, %c0_251], %242 {strides = array<i32>} : memref<8x128xbf16, #tpu.memory_space<vmem>>, vector<8x128xbf16>,
    %c0_252 = arith.constant 0 : index
    %c0_253 = arith.constant 0 : index
    %244 = vector.load %arg2[%c0_252, %c0_253] : memref<8x8xf32, #tpu.memory_space<vmem>>, vector<8x8xf32>
    %245 = arith.truncf %244 : vector<8x8xf32> to vector<8x8xbf16>
    %c0_254 = arith.constant 0 : index
    %c0_255 = arith.constant 0 : index
    %246 = vector.load %arg11[%c0_254, %c0_255] : memref<8x128xbf16, #tpu.memory_space<vmem>>, vector<8x8xbf16>
    tpu.vector_store %arg11[%c0_254, %c0_255], %245 {strides = array<i32>} : memref<8x128xbf16, #tpu.memory_space<vmem>>, vector<8x8xbf16>,
    %c0_256 = arith.constant 0 : index
    %c0_257 = arith.constant 0 : index
    %247 = vector.load %arg11[%c0_256, %c0_257] : memref<8x128xbf16, #tpu.memory_space<vmem>>, vector<8x128xbf16>
    %c2_i32_258 = arith.constant 2 : i32
    %c2_i32_259 = arith.constant 2 : i32
    %c2_i32_260 = arith.constant 2 : i32
    %c0_i32_261 = arith.constant 0 : i32
    %c0_i32_262 = arith.constant 0 : i32
    %c0_i32_263 = arith.constant 0 : i32
    %248 = tpu.memref_slice %arg3[%c2_i32_258, %c0_i32_261, %c0_i32_262, %c0_i32_263] : memref<3x10x128x128xbf16, #tpu.memory_space<any>> -> memref<1x10x128x128xbf16, #tpu.memory_space<any>>
    %249 = tpu.memref_squeeze %248 : memref<1x10x128x128xbf16, #tpu.memory_space<any>> -> memref<10x128x128xbf16, #tpu.memory_space<any>>
    %c0_i32_264 = arith.constant 0 : i32
    %c0_i32_265 = arith.constant 0 : i32
    %c0_i32_266 = arith.constant 0 : i32
    %250 = tpu.memref_slice %arg10[%c2_i32_259, %c0_i32_264, %c0_i32_265, %c0_i32_266] : memref<3x10x128x128xbf16, #tpu.memory_space<vmem>> -> memref<1x10x128x128xbf16, #tpu.memory_space<vmem>>
    %251 = tpu.memref_squeeze %250 : memref<1x10x128x128xbf16, #tpu.memory_space<vmem>> -> memref<10x128x128xbf16, #tpu.memory_space<vmem>>
    %252 = tpu.memref_slice %arg12[%c2_i32_260] : memref<3x!tpu.dma_semaphore, #tpu.memory_space<semaphore_mem>> -> memref<1x!tpu.dma_semaphore, #tpu.memory_space<semaphore_mem>>
    %253 = tpu.memref_squeeze %252 : memref<1x!tpu.dma_semaphore, #tpu.memory_space<semaphore_mem>> -> memref<!tpu.dma_semaphore, #tpu.memory_space<semaphore_mem>>
    tpu.wait_dma2 semaphore(%253 : memref<!tpu.dma_semaphore, #tpu.memory_space<semaphore_mem>>) src(%249 : memref<10x128x128xbf16, #tpu.memory_space<any>>) dst(%251 : memref<10x128x128xbf16, #tpu.memory_space<vmem>>)
    %c2_267 = arith.constant 2 : index
    %c0_268 = arith.constant 0 : index
    %c0_269 = arith.constant 0 : index
    %c0_270 = arith.constant 0 : index
    %254 = vector.load %arg10[%c2_267, %c0_268, %c0_269, %c0_270] : memref<3x10x128x128xbf16, #tpu.memory_space<vmem>>, vector<1x1x128x128xbf16>
    %255 = vector.shape_cast %254 : vector<1x1x128x128xbf16> to vector<128x128xbf16>
    %cst_271 = arith.constant dense<0.000000e+00> : vector<8x128xf32>
    %256 = tpu.matmul %247, %255, %cst_271 {dimension_numbers = #tpu.dot_dimension_numbers<[1], [0], [0], [1], [0, 0, 1, 1], [], []>} : vector<8x128xbf16>, vector<128x128xbf16>, vector<8x128xf32> -> vector<8x128xf32>
    %c2_272 = arith.constant 2 : index
    %c0_273 = arith.constant 0 : index
    %c0_274 = arith.constant 0 : index
    %c0_275 = arith.constant 0 : index
    %257 = vector.load %arg4[%c2_272, %c0_273, %c0_274, %c0_275] : memref<3x10x1x128xf32, #tpu.memory_space<vmem>>, vector<1x1x1x128xf32>
    %258 = vector.shape_cast %257 : vector<1x1x1x128xf32> to vector<1x128xf32>
    %259 = vector.broadcast %258 : vector<1x128xf32> to vector<8x128xf32>
    %260 = arith.addf %256, %259 : vector<8x128xf32>
    %cst_276 = arith.constant 0.000000e+00 : f32
    %261 = vector.broadcast %cst_276 : f32 to vector<8x128xf32>
    %262 = arith.maximumf %260, %261 : vector<8x128xf32>
    %263 = arith.truncf %262 : vector<8x128xf32> to vector<8x128xbf16>
    %c2_277 = arith.constant 2 : index
    %c1_278 = arith.constant 1 : index
    %c0_279 = arith.constant 0 : index
    %c0_280 = arith.constant 0 : index
    %264 = vector.load %arg10[%c2_277, %c1_278, %c0_279, %c0_280] : memref<3x10x128x128xbf16, #tpu.memory_space<vmem>>, vector<1x1x128x128xbf16>
    %265 = vector.shape_cast %264 : vector<1x1x128x128xbf16> to vector<128x128xbf16>
    %cst_281 = arith.constant dense<0.000000e+00> : vector<8x128xf32>
    %266 = tpu.matmul %263, %265, %cst_281 {dimension_numbers = #tpu.dot_dimension_numbers<[1], [0], [0], [1], [0, 0, 1, 1], [], []>} : vector<8x128xbf16>, vector<128x128xbf16>, vector<8x128xf32> -> vector<8x128xf32>
    %c2_282 = arith.constant 2 : index
    %c1_283 = arith.constant 1 : index
    %c0_284 = arith.constant 0 : index
    %c0_285 = arith.constant 0 : index
    %267 = vector.load %arg4[%c2_282, %c1_283, %c0_284, %c0_285] : memref<3x10x1x128xf32, #tpu.memory_space<vmem>>, vector<1x1x1x128xf32>
    %268 = vector.shape_cast %267 : vector<1x1x1x128xf32> to vector<1x128xf32>
    %269 = vector.broadcast %268 : vector<1x128xf32> to vector<8x128xf32>
    %270 = arith.addf %266, %269 : vector<8x128xf32>
    %cst_286 = arith.constant 0.000000e+00 : f32
    %271 = vector.broadcast %cst_286 : f32 to vector<8x128xf32>
    %272 = arith.maximumf %270, %271 : vector<8x128xf32>
    %273 = arith.truncf %272 : vector<8x128xf32> to vector<8x128xbf16>
    %c2_287 = arith.constant 2 : index
    %c2_288 = arith.constant 2 : index
    %c0_289 = arith.constant 0 : index
    %c0_290 = arith.constant 0 : index
    %274 = vector.load %arg10[%c2_287, %c2_288, %c0_289, %c0_290] : memref<3x10x128x128xbf16, #tpu.memory_space<vmem>>, vector<1x1x128x128xbf16>
    %275 = vector.shape_cast %274 : vector<1x1x128x128xbf16> to vector<128x128xbf16>
    %cst_291 = arith.constant dense<0.000000e+00> : vector<8x128xf32>
    %276 = tpu.matmul %273, %275, %cst_291 {dimension_numbers = #tpu.dot_dimension_numbers<[1], [0], [0], [1], [0, 0, 1, 1], [], []>} : vector<8x128xbf16>, vector<128x128xbf16>, vector<8x128xf32> -> vector<8x128xf32>
    %c2_292 = arith.constant 2 : index
    %c2_293 = arith.constant 2 : index
    %c0_294 = arith.constant 0 : index
    %c0_295 = arith.constant 0 : index
    %277 = vector.load %arg4[%c2_292, %c2_293, %c0_294, %c0_295] : memref<3x10x1x128xf32, #tpu.memory_space<vmem>>, vector<1x1x1x128xf32>
    %278 = vector.shape_cast %277 : vector<1x1x1x128xf32> to vector<1x128xf32>
    %279 = vector.broadcast %278 : vector<1x128xf32> to vector<8x128xf32>
    %280 = arith.addf %276, %279 : vector<8x128xf32>
    %cst_296 = arith.constant 0.000000e+00 : f32
    %281 = vector.broadcast %cst_296 : f32 to vector<8x128xf32>
    %282 = arith.maximumf %280, %281 : vector<8x128xf32>
    %283 = arith.truncf %282 : vector<8x128xf32> to vector<8x128xbf16>
    %c2_297 = arith.constant 2 : index
    %c3_298 = arith.constant 3 : index
    %c0_299 = arith.constant 0 : index
    %c0_300 = arith.constant 0 : index
    %284 = vector.load %arg10[%c2_297, %c3_298, %c0_299, %c0_300] : memref<3x10x128x128xbf16, #tpu.memory_space<vmem>>, vector<1x1x128x128xbf16>
    %285 = vector.shape_cast %284 : vector<1x1x128x128xbf16> to vector<128x128xbf16>
    %cst_301 = arith.constant dense<0.000000e+00> : vector<8x128xf32>
    %286 = tpu.matmul %283, %285, %cst_301 {dimension_numbers = #tpu.dot_dimension_numbers<[1], [0], [0], [1], [0, 0, 1, 1], [], []>} : vector<8x128xbf16>, vector<128x128xbf16>, vector<8x128xf32> -> vector<8x128xf32>
    %c2_302 = arith.constant 2 : index
    %c3_303 = arith.constant 3 : index
    %c0_304 = arith.constant 0 : index
    %c0_305 = arith.constant 0 : index
    %287 = vector.load %arg4[%c2_302, %c3_303, %c0_304, %c0_305] : memref<3x10x1x128xf32, #tpu.memory_space<vmem>>, vector<1x1x1x128xf32>
    %288 = vector.shape_cast %287 : vector<1x1x1x128xf32> to vector<1x128xf32>
    %289 = vector.broadcast %288 : vector<1x128xf32> to vector<8x128xf32>
    %290 = arith.addf %286, %289 : vector<8x128xf32>
    %cst_306 = arith.constant 0.000000e+00 : f32
    %291 = vector.broadcast %cst_306 : f32 to vector<8x128xf32>
    %292 = arith.maximumf %290, %291 : vector<8x128xf32>
    %293 = arith.truncf %292 : vector<8x128xf32> to vector<8x128xbf16>
    %c2_307 = arith.constant 2 : index
    %c4_308 = arith.constant 4 : index
    %c0_309 = arith.constant 0 : index
    %c0_310 = arith.constant 0 : index
    %294 = vector.load %arg10[%c2_307, %c4_308, %c0_309, %c0_310] : memref<3x10x128x128xbf16, #tpu.memory_space<vmem>>, vector<1x1x128x128xbf16>
    %295 = vector.shape_cast %294 : vector<1x1x128x128xbf16> to vector<128x128xbf16>
    %cst_311 = arith.constant dense<0.000000e+00> : vector<8x128xf32>
    %296 = tpu.matmul %293, %295, %cst_311 {dimension_numbers = #tpu.dot_dimension_numbers<[1], [0], [0], [1], [0, 0, 1, 1], [], []>} : vector<8x128xbf16>, vector<128x128xbf16>, vector<8x128xf32> -> vector<8x128xf32>
    %c2_312 = arith.constant 2 : index
    %c4_313 = arith.constant 4 : index
    %c0_314 = arith.constant 0 : index
    %c0_315 = arith.constant 0 : index
    %297 = vector.load %arg4[%c2_312, %c4_313, %c0_314, %c0_315] : memref<3x10x1x128xf32, #tpu.memory_space<vmem>>, vector<1x1x1x128xf32>
    %298 = vector.shape_cast %297 : vector<1x1x1x128xf32> to vector<1x128xf32>
    %299 = vector.broadcast %298 : vector<1x128xf32> to vector<8x128xf32>
    %300 = arith.addf %296, %299 : vector<8x128xf32>
    %cst_316 = arith.constant 0.000000e+00 : f32
    %301 = vector.broadcast %cst_316 : f32 to vector<8x128xf32>
    %302 = arith.maximumf %300, %301 : vector<8x128xf32>
    %303 = arith.truncf %302 : vector<8x128xf32> to vector<8x128xbf16>
    %c2_317 = arith.constant 2 : index
    %c5_318 = arith.constant 5 : index
    %c0_319 = arith.constant 0 : index
    %c0_320 = arith.constant 0 : index
    %304 = vector.load %arg10[%c2_317, %c5_318, %c0_319, %c0_320] : memref<3x10x128x128xbf16, #tpu.memory_space<vmem>>, vector<1x1x128x128xbf16>
    %305 = vector.shape_cast %304 : vector<1x1x128x128xbf16> to vector<128x128xbf16>
    %cst_321 = arith.constant dense<0.000000e+00> : vector<8x128xf32>
    %306 = tpu.matmul %303, %305, %cst_321 {dimension_numbers = #tpu.dot_dimension_numbers<[1], [0], [0], [1], [0, 0, 1, 1], [], []>} : vector<8x128xbf16>, vector<128x128xbf16>, vector<8x128xf32> -> vector<8x128xf32>
    %c2_322 = arith.constant 2 : index
    %c5_323 = arith.constant 5 : index
    %c0_324 = arith.constant 0 : index
    %c0_325 = arith.constant 0 : index
    %307 = vector.load %arg4[%c2_322, %c5_323, %c0_324, %c0_325] : memref<3x10x1x128xf32, #tpu.memory_space<vmem>>, vector<1x1x1x128xf32>
    %308 = vector.shape_cast %307 : vector<1x1x1x128xf32> to vector<1x128xf32>
    %309 = vector.broadcast %308 : vector<1x128xf32> to vector<8x128xf32>
    %310 = arith.addf %306, %309 : vector<8x128xf32>
    %cst_326 = arith.constant 0.000000e+00 : f32
    %311 = vector.broadcast %cst_326 : f32 to vector<8x128xf32>
    %312 = arith.maximumf %310, %311 : vector<8x128xf32>
    %313 = arith.truncf %312 : vector<8x128xf32> to vector<8x128xbf16>
    %c2_327 = arith.constant 2 : index
    %c6_328 = arith.constant 6 : index
    %c0_329 = arith.constant 0 : index
    %c0_330 = arith.constant 0 : index
    %314 = vector.load %arg10[%c2_327, %c6_328, %c0_329, %c0_330] : memref<3x10x128x128xbf16, #tpu.memory_space<vmem>>, vector<1x1x128x128xbf16>
    %315 = vector.shape_cast %314 : vector<1x1x128x128xbf16> to vector<128x128xbf16>
    %cst_331 = arith.constant dense<0.000000e+00> : vector<8x128xf32>
    %316 = tpu.matmul %313, %315, %cst_331 {dimension_numbers = #tpu.dot_dimension_numbers<[1], [0], [0], [1], [0, 0, 1, 1], [], []>} : vector<8x128xbf16>, vector<128x128xbf16>, vector<8x128xf32> -> vector<8x128xf32>
    %c2_332 = arith.constant 2 : index
    %c6_333 = arith.constant 6 : index
    %c0_334 = arith.constant 0 : index
    %c0_335 = arith.constant 0 : index
    %317 = vector.load %arg4[%c2_332, %c6_333, %c0_334, %c0_335] : memref<3x10x1x128xf32, #tpu.memory_space<vmem>>, vector<1x1x1x128xf32>
    %318 = vector.shape_cast %317 : vector<1x1x1x128xf32> to vector<1x128xf32>
    %319 = vector.broadcast %318 : vector<1x128xf32> to vector<8x128xf32>
    %320 = arith.addf %316, %319 : vector<8x128xf32>
    %cst_336 = arith.constant 0.000000e+00 : f32
    %321 = vector.broadcast %cst_336 : f32 to vector<8x128xf32>
    %322 = arith.maximumf %320, %321 : vector<8x128xf32>
    %323 = arith.truncf %322 : vector<8x128xf32> to vector<8x128xbf16>
    %c2_337 = arith.constant 2 : index
    %c7_338 = arith.constant 7 : index
    %c0_339 = arith.constant 0 : index
    %c0_340 = arith.constant 0 : index
    %324 = vector.load %arg10[%c2_337, %c7_338, %c0_339, %c0_340] : memref<3x10x128x128xbf16, #tpu.memory_space<vmem>>, vector<1x1x128x128xbf16>
    %325 = vector.shape_cast %324 : vector<1x1x128x128xbf16> to vector<128x128xbf16>
    %cst_341 = arith.constant dense<0.000000e+00> : vector<8x128xf32>
    %326 = tpu.matmul %323, %325, %cst_341 {dimension_numbers = #tpu.dot_dimension_numbers<[1], [0], [0], [1], [0, 0, 1, 1], [], []>} : vector<8x128xbf16>, vector<128x128xbf16>, vector<8x128xf32> -> vector<8x128xf32>
    %c2_342 = arith.constant 2 : index
    %c7_343 = arith.constant 7 : index
    %c0_344 = arith.constant 0 : index
    %c0_345 = arith.constant 0 : index
    %327 = vector.load %arg4[%c2_342, %c7_343, %c0_344, %c0_345] : memref<3x10x1x128xf32, #tpu.memory_space<vmem>>, vector<1x1x1x128xf32>
    %328 = vector.shape_cast %327 : vector<1x1x1x128xf32> to vector<1x128xf32>
    %329 = vector.broadcast %328 : vector<1x128xf32> to vector<8x128xf32>
    %330 = arith.addf %326, %329 : vector<8x128xf32>
    %cst_346 = arith.constant 0.000000e+00 : f32
    %331 = vector.broadcast %cst_346 : f32 to vector<8x128xf32>
    %332 = arith.maximumf %330, %331 : vector<8x128xf32>
    %333 = arith.truncf %332 : vector<8x128xf32> to vector<8x128xbf16>
    %c2_347 = arith.constant 2 : index
    %c8_348 = arith.constant 8 : index
    %c0_349 = arith.constant 0 : index
    %c0_350 = arith.constant 0 : index
    %334 = vector.load %arg10[%c2_347, %c8_348, %c0_349, %c0_350] : memref<3x10x128x128xbf16, #tpu.memory_space<vmem>>, vector<1x1x128x128xbf16>
    %335 = vector.shape_cast %334 : vector<1x1x128x128xbf16> to vector<128x128xbf16>
    %cst_351 = arith.constant dense<0.000000e+00> : vector<8x128xf32>
    %336 = tpu.matmul %333, %335, %cst_351 {dimension_numbers = #tpu.dot_dimension_numbers<[1], [0], [0], [1], [0, 0, 1, 1], [], []>} : vector<8x128xbf16>, vector<128x128xbf16>, vector<8x128xf32> -> vector<8x128xf32>
    %c2_352 = arith.constant 2 : index
    %c8_353 = arith.constant 8 : index
    %c0_354 = arith.constant 0 : index
    %c0_355 = arith.constant 0 : index
    %337 = vector.load %arg4[%c2_352, %c8_353, %c0_354, %c0_355] : memref<3x10x1x128xf32, #tpu.memory_space<vmem>>, vector<1x1x1x128xf32>
    %338 = vector.shape_cast %337 : vector<1x1x1x128xf32> to vector<1x128xf32>
    %339 = vector.broadcast %338 : vector<1x128xf32> to vector<8x128xf32>
    %340 = arith.addf %336, %339 : vector<8x128xf32>
    %cst_356 = arith.constant 0.000000e+00 : f32
    %341 = vector.broadcast %cst_356 : f32 to vector<8x128xf32>
    %342 = arith.maximumf %340, %341 : vector<8x128xf32>
    %343 = arith.truncf %342 : vector<8x128xf32> to vector<8x128xbf16>
    %c2_357 = arith.constant 2 : index
    %c9_358 = arith.constant 9 : index
    %c0_359 = arith.constant 0 : index
    %c0_360 = arith.constant 0 : index
    %344 = vector.load %arg10[%c2_357, %c9_358, %c0_359, %c0_360] : memref<3x10x128x128xbf16, #tpu.memory_space<vmem>>, vector<1x1x128x128xbf16>
    %345 = vector.shape_cast %344 : vector<1x1x128x128xbf16> to vector<128x128xbf16>
    %cst_361 = arith.constant dense<0.000000e+00> : vector<8x128xf32>
    %346 = tpu.matmul %343, %345, %cst_361 {dimension_numbers = #tpu.dot_dimension_numbers<[1], [0], [0], [1], [0, 0, 1, 1], [], []>} : vector<8x128xbf16>, vector<128x128xbf16>, vector<8x128xf32> -> vector<8x128xf32>
    %c2_362 = arith.constant 2 : index
    %c9_363 = arith.constant 9 : index
    %c0_364 = arith.constant 0 : index
    %c0_365 = arith.constant 0 : index
    %347 = vector.load %arg4[%c2_362, %c9_363, %c0_364, %c0_365] : memref<3x10x1x128xf32, #tpu.memory_space<vmem>>, vector<1x1x1x128xf32>
    %348 = vector.shape_cast %347 : vector<1x1x1x128xf32> to vector<1x128xf32>
    %349 = vector.broadcast %348 : vector<1x128xf32> to vector<8x128xf32>
    %350 = arith.addf %346, %349 : vector<8x128xf32>
    %cst_366 = arith.constant 0.000000e+00 : f32
    %351 = vector.broadcast %cst_366 : f32 to vector<8x128xf32>
    %352 = arith.maximumf %350, %351 : vector<8x128xf32>
    %353 = arith.truncf %352 : vector<8x128xf32> to vector<8x128xbf16>
    %c0_367 = arith.constant 0 : index
    %c0_368 = arith.constant 0 : index
    %c0_369 = arith.constant 0 : index
    %354 = vector.load %arg5[%c0_367, %c0_368, %c0_369] : memref<3x128x128xbf16, #tpu.memory_space<vmem>>, vector<1x128x128xbf16>
    %355 = vector.shape_cast %354 : vector<1x128x128xbf16> to vector<128x128xbf16>
    %cst_370 = arith.constant dense<0.000000e+00> : vector<8x128xf32>
    %356 = tpu.matmul %129, %355, %cst_370 {dimension_numbers = #tpu.dot_dimension_numbers<[1], [0], [0], [1], [0, 0, 1, 1], [], []>} : vector<8x128xbf16>, vector<128x128xbf16>, vector<8x128xf32> -> vector<8x128xf32>
    %c1_371 = arith.constant 1 : index
    %c0_372 = arith.constant 0 : index
    %c0_373 = arith.constant 0 : index
    %357 = vector.load %arg5[%c1_371, %c0_372, %c0_373] : memref<3x128x128xbf16, #tpu.memory_space<vmem>>, vector<1x128x128xbf16>
    %358 = vector.shape_cast %357 : vector<1x128x128xbf16> to vector<128x128xbf16>
    %cst_374 = arith.constant dense<0.000000e+00> : vector<8x128xf32>
    %359 = tpu.matmul %241, %358, %cst_374 {dimension_numbers = #tpu.dot_dimension_numbers<[1], [0], [0], [1], [0, 0, 1, 1], [], []>} : vector<8x128xbf16>, vector<128x128xbf16>, vector<8x128xf32> -> vector<8x128xf32>
    %360 = arith.addf %356, %359 : vector<8x128xf32>
    %c2_375 = arith.constant 2 : index
    %c0_376 = arith.constant 0 : index
    %c0_377 = arith.constant 0 : index
    %361 = vector.load %arg5[%c2_375, %c0_376, %c0_377] : memref<3x128x128xbf16, #tpu.memory_space<vmem>>, vector<1x128x128xbf16>
    %362 = vector.shape_cast %361 : vector<1x128x128xbf16> to vector<128x128xbf16>
    %cst_378 = arith.constant dense<0.000000e+00> : vector<8x128xf32>
    %363 = tpu.matmul %353, %362, %cst_378 {dimension_numbers = #tpu.dot_dimension_numbers<[1], [0], [0], [1], [0, 0, 1, 1], [], []>} : vector<8x128xbf16>, vector<128x128xbf16>, vector<8x128xf32> -> vector<8x128xf32>
    %364 = arith.addf %360, %363 : vector<8x128xf32>
    %c0_379 = arith.constant 0 : index
    %c0_380 = arith.constant 0 : index
    %365 = vector.load %arg6[%c0_379, %c0_380] : memref<1x128xf32, #tpu.memory_space<vmem>>, vector<1x128xf32>
    %366 = vector.broadcast %365 : vector<1x128xf32> to vector<8x128xf32>
    %367 = arith.addf %364, %366 : vector<8x128xf32>
    %cst_381 = arith.constant 0.000000e+00 : f32
    %368 = vector.broadcast %cst_381 : f32 to vector<8x128xf32>
    %369 = arith.maximumf %367, %368 : vector<8x128xf32>
    %c0_382 = arith.constant 0 : index
    %c0_383 = arith.constant 0 : index
    %370 = vector.load %arg7[%c0_382, %c0_383] : memref<1x128xf32, #tpu.memory_space<vmem>>, vector<1x128xf32>
    %371 = vector.broadcast %370 : vector<1x128xf32> to vector<8x128xf32>
    %372 = arith.mulf %369, %371 : vector<8x128xf32>
    %cst_384 = arith.constant dense<0.000000e+00> : vector<8xf32>
    %373 = vector.multi_reduction <add>, %372, %cst_384 [1] : vector<8x128xf32> to vector<8xf32>
    %374 = vector.shape_cast %373 : vector<8xf32> to vector<8x1xf32>
    %c0_385 = arith.constant 0 : index
    %c0_386 = arith.constant 0 : index
    %375 = vector.load %arg8[%c0_385, %c0_386] : memref<1x1xf32, #tpu.memory_space<vmem>>, vector<1x1xf32>
    %376 = vector.broadcast %375 : vector<1x1xf32> to vector<8x1xf32>
    %377 = arith.addf %374, %376 : vector<8x1xf32>
    %c0_387 = arith.constant 0 : index
    %c0_388 = arith.constant 0 : index
    %378 = vector.load %arg9[%c0_387, %c0_388] : memref<8x1xf32, #tpu.memory_space<vmem>>, vector<8x1xf32>
    tpu.vector_store %arg9[%c0_387, %c0_388], %377 {strides = array<i32>} : memref<8x1xf32, #tpu.memory_space<vmem>>, vector<8x1xf32>,
    return
  }
}

</mosaic_0001>

<bundles_post_ra>
// kernel: multibranch_forward.1
= control target key start
LH: loop header
LB: loop body
LE: loop exit
PB: predicated region body
PF: predicated region fallthrough
CT: control target
= control target key end

     0   :  { %s4691_s0 = inlined_call_operand.hbm [shape: f32[8,16], index: 0, kind: input, shape index: {}]   ;;  %s4692_s1 = inlined_call_operand.hbm [shape: f32[8,24], index: 1, kind: input, shape index: {}]   ;;  %s4693_s2 = inlined_call_operand.hbm [shape: f32[8,8], index: 2, kind: input, shape index: {}]   ;;  %s4694_s3 = inlined_call_operand.hbm [shape: bf16[3,10,128,128], index: 3, kind: input, shape index: {}]   ;;  %s4695_s4 = inlined_call_operand.hbm [shape: f32[3,10,1,128], index: 4, kind: input, shape index: {}]   ;;  %s4696_s5 = inlined_call_operand.hbm [shape: bf16[3,128,128], index: 5, kind: input, shape index: {}]   ;;  %s4697_s6 = inlined_call_operand.vmem [shape: f32[1,128], index: 6, kind: input, shape index: {}]   ;;  %s4698_s7 = inlined_call_operand.vmem [shape: f32[1,128], index: 7, kind: input, shape index: {}]   ;;  %s4699_s8 = inlined_call_operand.<no memory space> [shape: f32[1,1], index: 8, kind: input, shape index: {}]   ;;  %s4700_s9 = inlined_call_operand.vmem [shape: f32[8,1], index: 9, kind: output, shape index: {}]  }
   0x1   :  { %v14_v0 = vstv %s4699_s8 }
   0x2   :  { %15 = vst [vmem:[#allocation5] sm:$0x1] %v14_v0 }
   0x3   :  { %16 = vsyncpa [#allocation7], 0 }
   0x4   :  { %17 = vsyncpa [#allocation9], 0  ;;  %s35_s13 = sshll.u32 %s4692_s1, 4  ;;  %s36_s13 = int_to_ptr.hbm [resolvable:$true] %s35_s13 }
   0x5   :  { %18 = vsyncpa [#allocation12], 0  ;;  %s4577_s14 = smov [#allocation8]   ;;  %s56_s18 = sshll.u32 %s4695_s4, 4  ;;  %s57_s18 = int_to_ptr.hbm [resolvable:$true] %s56_s18 }
   0x6   :  { %s37_s15 = sshll.u32 %s4577_s14, 4  ;;  %s4578_s19 = smov [#allocation11]   ;;  %s38_s15 = int_to_ptr.vmem [resolvable:$true] %s37_s15 }
   0x7   :  { %40 = dma.hbm_to_vmem [thread:$0]  %s36_s13, 128, %s38_s15, [#allocation9]  }
   0x8   :  { %s58_s8 = sshll.u32 %s4578_s19, 4  ;;  %s4579_s20 = smov 16   ;;  %s59_s8 = int_to_ptr.vmem [resolvable:$true] %s58_s8 }
   0x9   :  { %s4580_s21 = smov 1   ;;  %s24_s1 = sshll.u32 %s4691_s0, 4  ;;  %s25_s1 = int_to_ptr.hbm [resolvable:$true] %s24_s1 }
   0xa   :  { %64 = dma.hbm_to_vmem [thread:$0]  %s57_s18, 480, %s59_s8, [#allocation12], %s4579_s20, %s4579_s20, %s4580_s21  }
   0xb   :  { %s4581_s24 = smov [#allocation6]   ;;  %s46_s4 = sshll.u32 %s4693_s2, 4  ;;  %s47_s4 = int_to_ptr.hbm [resolvable:$true] %s46_s4 }
   0xc   :  { %s26_s25 = sshll.u32 %s4581_s24, 4  ;;  %s4582_s28 = smov [#allocation10]   ;;  %s27_s25 = int_to_ptr.vmem [resolvable:$true] %s26_s25 }
   0xd   :  { %29 = dma.hbm_to_vmem [thread:$0]  %s25_s1, 128, %s27_s25, [#allocation7]  }
   0xe   :  { %s48_s29 = sshll.u32 %s4582_s28, 4  ;;  %s69_s11 = sshll.u32 %s4696_s5, 4  ;;  %s49_s29 = int_to_ptr.vmem [resolvable:$true] %s48_s29  ;;  %s70_s11 = int_to_ptr.hbm [resolvable:$true] %s69_s11 }
   0xf   :  { %51 = dma.hbm_to_vmem [thread:$0]  %s47_s4, 128, %s49_s29, [#allocation9]  }
  0x10   :  { %s4583_s0 = smov [#allocation13]   ;;  %s4584_s13 = smov 64  }
  0x11   :  { %s71_s12 = sshll.u32 %s4583_s0, 4  ;;  %s4585_s14 = smov 4   ;;  %s72_s12 = int_to_ptr.vmem [resolvable:$true] %s71_s12 }
  0x12   :  { %77 = dma.hbm_to_vmem [thread:$0]  %s70_s11, 3072, %s72_s12, [#allocation12], %s4584_s13, %s4584_s13, %s4585_s14  }
  0x13   :  { %4565 = dma.done.wait [#allocation7], 128  }
  0x14   :  { %4566 = vsyncadd [#allocation7], 4294967168 }
  0x15   :  { %4567 = dma.done.wait [#allocation9], 256  }
  0x16   :  { %4568 = vsyncadd [#allocation9], 4294967040 }
  0x17   :  { %4569 = dma.done.wait [#allocation12], 3552  }
  0x18   :  { %4570 = vsyncadd [#allocation12], 4294963744  ;;  %s112_s16 = sshll.u32 %s4694_s3, 4  ;;  %v4586_v1 = vmov 0   ;;  %s4587_s5 = smov [#allocation2]   ;;  %v151_v2 = vld [vmem:[#allocation6] sm:$0xff]  ;;  %s113_s16 = int_to_ptr.hbm [resolvable:$true] %s112_s16 }
  0x19   :  { %150 = vst [vmem:[#allocation3] sm:$0xf] %v4586_v1  ;;  %s114_s17 = sshll.u32 %s4587_s5, 4  ;;  %s118_s8 = scalar_lea.hbm %s4694_s3, 640  ;;  %vm153_vm0 = vcmask 125952   ;;  %v152_v3 = vpack.c.bf16 %v151_v2, %v151_v2  ;;  %s115_s17 = int_to_ptr.vmem [resolvable:$true] %s114_s17 }
  0x1a   :  { %117 = dma.hbm_to_vmem [thread:$0]  %s113_s16, 10240, %s115_s17, [#allocation4] }
  0x1b   :  { %s128_s20 = sshll.u32 %s118_s8, 4  ;;  %s4588_s21 = smov [#allocation2 + $0x280]   ;;  %154 = vst.msk [vmem:[#allocation3] sm:$0xf] %vm153_vm0, %v152_v3  ;;  %s129_s20 = int_to_ptr.hbm [resolvable:$true] %s128_s20 }
  0x1c   :  { %s130_s22 = sshll.u32 %s4588_s21, 4  ;;  %s134_s24 = scalar_lea.hbm %s4694_s3, 1280  ;;  %s131_s22 = int_to_ptr.vmem [resolvable:$true] %s130_s22 }
  0x1d   :  { %133 = dma.hbm_to_vmem [thread:$0]  %s129_s20, 10240, %s131_s22, [#allocation4 + $0x1] }
  0x1e   :  { %s144_s25 = sshll.u32 %s134_s24, 4  ;;  %s4589_s26 = smov [#allocation2 + $0x500]   ;;  %s145_s25 = int_to_ptr.hbm [resolvable:$true] %s144_s25 }
  0x1f   :  { %s146_s27 = sshll.u32 %s4589_s26, 4  ;;  %s147_s27 = int_to_ptr.vmem [resolvable:$true] %s146_s27 }
  0x20   :  { %149 = dma.hbm_to_vmem [thread:$0]  %s145_s25, 10240, %s147_s27, [#allocation4 + $0x2] }
  0x22   :  { %v155_v4 = vld [vmem:[#allocation3] sm:$0xf] }
  0x23   :  { %4571 = dma.done.wait [#allocation4], 10240 }
  0x24   :  { %4572 = vsyncadd [#allocation4], 4294957056  ;;  %1009 = vst [vmem:[#allocation3] sm:$0xf] %v4586_v1  ;;  %v1010_v5 = vld [vmem:[#allocation8] sm:$0xff]  ;;  %vm1012_vm1 = vcmask 191488  }
  0x25   :  { %v4070_v6 = vld [vmem:[#allocation2 + $0x38] sm:$0xff]  ;;  %v1011_v7 = vpack.c.bf16 %v1010_v5, %v1010_v5  ;;  %v4069_v8 = vld [vmem:[#allocation2 + $0x30] sm:$0xff]  ;;  %v4068_v10 = vld [vmem:[#allocation2 + $0x28] sm:$0xff] }
  0x26   :  { %229 = vmatpush.bf16.msra.mxu0 %v4070_v6  ;;  %v4078_v9 = vld [vmem:[#allocation2 + $0x78] sm:$0xff]  ;;  %v4077_v11 = vld [vmem:[#allocation2 + $0x70] sm:$0xff]  ;;  %v4076_v12 = vld [vmem:[#allocation2 + $0x68] sm:$0xff] }
  0x27   :  { %1013 = vst.msk [vmem:[#allocation3] sm:$0xf] %vm1012_vm1, %v1011_v7  ;;  %314 = vmatpush.bf16.msra.mxu1 %v4078_v9  ;;  %v4067_v14 = vld [vmem:[#allocation2 + $0x20] sm:$0xff]  ;;  %v4066_v16 = vld [vmem:[#allocation2 + $0x18] sm:$0xff]  ;;  %v4065_v18 = vld [vmem:[#allocation2 + $0x10] sm:$0xff] }
  0x28   :  { %v4075_v15 = vld [vmem:[#allocation2 + $0x60] sm:$0xff]  ;;  %v4074_v17 = vld [vmem:[#allocation2 + $0x58] sm:$0xff]  ;;  %v4073_v19 = vld [vmem:[#allocation2 + $0x50] sm:$0xff] }
  0x29   :  { %v4064_v20 = vld [vmem:[#allocation2 + $0x8] sm:$0xff]  ;;  %v4063_v21 = vld [vmem:[#allocation2] sm:$0xff]  ;;  %v4086_v24 = vld [vmem:[#allocation2 + $0xb8] sm:$0xff] }
  0x2a   :  { %230 = vmatpush.bf16.msra.mxu0 %v4069_v8  ;;  %v4072_v22 = vld [vmem:[#allocation2 + $0x48] sm:$0xff]  ;;  %v4071_v23 = vld [vmem:[#allocation2 + $0x40] sm:$0xff]  ;;  %399 = vmatpush.bf16.msra.mxu2 %v4086_v24  ;;  %v4085_v25 = vld [vmem:[#allocation2 + $0xb0] sm:$0xff] }
  0x2b   :  { %315 = vmatpush.bf16.msra.mxu1 %v4077_v11  ;;  %v4084_v26 = vld [vmem:[#allocation2 + $0xa8] sm:$0xff]  ;;  %v4083_v27 = vld [vmem:[#allocation2 + $0xa0] sm:$0xff]  ;;  %v4082_v28 = vld [vmem:[#allocation2 + $0x98] sm:$0xff] }
  0x2c   :  { %v4081_v29 = vld [vmem:[#allocation2 + $0x90] sm:$0xff]  ;;  %v4340_v30 = vld [vmem:[#allocation11] ss:$0 sm:$0xff]  ;;  %v4080_v36 = vld [vmem:[#allocation2 + $0x88] sm:$0xff] }
  0x2d   :  { %v4079_v37 = vld [vmem:[#allocation2 + $0x80] sm:$0xff]  ;;  %v4094_v38 = vld [vmem:[#allocation2 + $0xf8] sm:$0xff]  ;;  %v4093_v39 = vld [vmem:[#allocation2 + $0xf0] sm:$0xff] }
  0x2e   :  { %v4669_v13 = vld [vmem:[#allocation3] sm:$0xf]  ;;  %231 = vmatpush.bf16.msra.mxu0 %v4068_v10  ;;  %400 = vmatpush.bf16.msra.mxu2 %v4085_v25  ;;  %v4092_v40 = vld [vmem:[#allocation2 + $0xe8] sm:$0xff]  ;;  %v4090_v42 = vld [vmem:[#allocation2 + $0xd8] sm:$0xff] }
  0x2f   :  { %316 = vmatpush.bf16.msra.mxu1 %v4076_v12  ;;  %484 = vmatpush.bf16.msra.mxu3 %v4094_v38  ;;  %v4091_v41 = vld [vmem:[#allocation2 + $0xe0] sm:$0xff]  ;;  %v4089_v43 = vld [vmem:[#allocation2 + $0xd0] sm:$0xff]  ;;  %v4341_v44 = vld [vmem:[#allocation11 + $0x1] ss:$0 sm:$0xff] }
  0x30   :  { %v4088_v50 = vld [vmem:[#allocation2 + $0xc8] sm:$0xff]  ;;  %v4087_v51 = vld [vmem:[#allocation2 + $0xc0] sm:$0xff]  ;;  %v4102_v52 = vld [vmem:[#allocation2 + $0x138] sm:$0xff] }
  0x31   :  { %v4101_v53 = vld [vmem:[#allocation2 + $0x130] sm:$0xff]  ;;  %v4100_v54 = vld [vmem:[#allocation2 + $0x128] sm:$0xff]  ;;  %v4099_v55 = vld [vmem:[#allocation2 + $0x120] sm:$0xff] }
  0x32   :  { %232 = vmatpush.bf16.msra.mxu0 %v4067_v14  ;;  %401 = vmatpush.bf16.msra.mxu2 %v4084_v26  ;;  %v4098_v56 = vld [vmem:[#allocation2 + $0x118] sm:$0xff]  ;;  %v4097_v57 = vld [vmem:[#allocation2 + $0x110] sm:$0xff]  ;;  %v4096_v0 = vld [vmem:[#allocation2 + $0x108] sm:$0xff] }
  0x33   :  { %317 = vmatpush.bf16.msra.mxu1 %v4075_v15  ;;  %485 = vmatpush.bf16.msra.mxu3 %v4093_v39  ;;  %v4342_v58 = vld [vmem:[#allocation11 + $0x2] ss:$0 sm:$0xff]  ;;  %v4095_v2 = vld [vmem:[#allocation2 + $0x100] sm:$0xff]  ;;  %v4108_v5 = vld [vmem:[#allocation2 + $0x168] sm:$0xff] }
  0x34   :  { %v4110_v3 = vld [vmem:[#allocation2 + $0x178] sm:$0xff]  ;;  %v4107_v6 = vld [vmem:[#allocation2 + $0x160] sm:$0xff]  ;;  %v4105_v8 = vld [vmem:[#allocation2 + $0x150] sm:$0xff] }
  0x35   :  { %v4106_v7 = vld [vmem:[#allocation2 + $0x158] sm:$0xff]  ;;  %v4343_v9 = vld [vmem:[#allocation11 + $0x3] ss:$0 sm:$0xff]  ;;  %v4344_v24 = vld [vmem:[#allocation11 + $0x4] ss:$0 sm:$0xff] }
  0x36   :  { %233 = vmatpush.bf16.msra.mxu0 %v4066_v16  ;;  %402 = vmatpush.bf16.msra.mxu2 %v4083_v27  ;;  %v4104_v16 = vld [vmem:[#allocation2 + $0x148] sm:$0xff]  ;;  %v4345_v38 = vld [vmem:[#allocation11 + $0x5] ss:$0 sm:$0xff] }
  0x37   :  { %318 = vmatpush.bf16.msra.mxu1 %v4074_v17  ;;  %486 = vmatpush.bf16.msra.mxu3 %v4092_v40  ;;  %v4103_v17 = vld [vmem:[#allocation2 + $0x140] sm:$0xff] }
  0x3a   :  { %234 = vmatpush.bf16.msra.mxu0 %v4065_v18  ;;  %403 = vmatpush.bf16.msra.mxu2 %v4082_v28  ;;  %v4118_v18 = vld [vmem:[#allocation2 + $0x1b8] sm:$0xff] }
  0x3b   :  { %319 = vmatpush.bf16.msra.mxu1 %v4073_v19  ;;  %487 = vmatpush.bf16.msra.mxu3 %v4091_v41  ;;  %v4117_v19 = vld [vmem:[#allocation2 + $0x1b0] sm:$0xff] }
  0x3e   :  { %235 = vmatpush.bf16.msra.mxu0 %v4064_v20  ;;  %404 = vmatpush.bf16.msra.mxu2 %v4081_v29  ;;  %v4116_v20 = vld [vmem:[#allocation2 + $0x1a8] sm:$0xff] }
  0x3f   :  { %320 = vmatpush.bf16.msra.mxu1 %v4072_v22  ;;  %488 = vmatpush.bf16.msra.mxu3 %v4090_v42  ;;  %v4114_v22 = vld [vmem:[#allocation2 + $0x198] sm:$0xff] }
  0x42   :  { %236 = vmatpush.bf16.msra.mxu0 %v4063_v21  ;;  %405 = vmatpush.bf16.msra.mxu2 %v4080_v36  ;;  %v4115_v21 = vld [vmem:[#allocation2 + $0x1a0] sm:$0xff]  ;;  %v4122_v36 = vld [vmem:[#allocation2 + $0x1d8] sm:$0xff] }
  0x43   :  { %321 = vmatpush.bf16.msra.mxu1 %v4071_v23  ;;  %489 = vmatpush.bf16.msra.mxu3 %v4089_v43  ;;  %v4113_v23 = vld [vmem:[#allocation2 + $0x190] sm:$0xff] }
  0x45   :  { %237 = vmatmul.bf16.vlgmr.msra.gmra.mxu0 %v155_v4  ;;  %v4109_v4 = vld [vmem:[#allocation2 + $0x170] sm:$0xff] }
  0x46   :  { %406 = vmatpush.bf16.msra.mxu2 %v4079_v37  ;;  %569 = vmatpush.bf16.msrb.mxu0 %v4102_v52  ;;  %v4121_v37 = vld [vmem:[#allocation2 + $0x1d0] sm:$0xff]  ;;  %v4346_v52 = vld [vmem:[#allocation11 + $0x6] ss:$0 sm:$0xff] }
  0x47   :  { %490 = vmatpush.bf16.msra.mxu3 %v4088_v50  ;;  %654 = vmatpush.bf16.msrb.mxu1 %v4110_v3  ;;  %v4130_v50 = vld [vmem:[#allocation2 + $0x218] sm:$0xff]  ;;  %v4347_v3 = vld [vmem:[#allocation11 + $0x7] ss:$0 sm:$0xff] }
  0x4a   :  { %570 = vmatpush.bf16.msrb.mxu0 %v4101_v53  ;;  %739 = vmatpush.bf16.msrb.mxu2 %v4118_v18  ;;  %v4349_v18 = vld [vmem:[#allocation11 + $0x9] ss:$0 sm:$0xff] }
  0x4b   :  { %491 = vmatpush.bf16.msra.mxu3 %v4087_v51  ;;  %655 = vmatpush.bf16.msrb.mxu1 %v4109_v4  ;;  %v4129_v51 = vld [vmem:[#allocation2 + $0x210] sm:$0xff] }
  0x4e   :  { %571 = vmatpush.bf16.msrb.mxu0 %v4100_v54  ;;  %740 = vmatpush.bf16.msrb.mxu2 %v4117_v19 }
  0x4f   :  { %656 = vmatpush.bf16.msrb.mxu1 %v4108_v5 }
  0x52   :  { %572 = vmatpush.bf16.msrb.mxu0 %v4099_v55  ;;  %741 = vmatpush.bf16.msrb.mxu2 %v4116_v20 }
  0x53   :  { %657 = vmatpush.bf16.msrb.mxu1 %v4107_v6 }
  0x56   :  { %573 = vmatpush.bf16.msrb.mxu0 %v4098_v56  ;;  %742 = vmatpush.bf16.msrb.mxu2 %v4115_v21 }
  0x57   :  { %658 = vmatpush.bf16.msrb.mxu1 %v4106_v7 }
  0x5a   :  { %574 = vmatpush.bf16.msrb.mxu0 %v4097_v57  ;;  %743 = vmatpush.bf16.msrb.mxu2 %v4114_v22 }
  0x5b   :  { %659 = vmatpush.bf16.msrb.mxu1 %v4105_v8 }
  0x5e   :  { %575 = vmatpush.bf16.msrb.mxu0 %v4096_v0  ;;  %744 = vmatpush.bf16.msrb.mxu2 %v4113_v23  ;;  %v4138_v0 = vld [vmem:[#allocation2 + $0x258] sm:$0xff] }
  0x5f   :  { %660 = vmatpush.bf16.msrb.mxu1 %v4104_v16 }
  0x62   :  { %576 = vmatpush.bf16.msrb.mxu0 %v4095_v2  ;;  %v4137_v2 = vld [vmem:[#allocation2 + $0x250] sm:$0xff] }
  0x63   :  { %661 = vmatpush.bf16.msrb.mxu1 %v4103_v17 }
  0xc2   :  { %v238_v31 = vpop.f32.mrf.mxu0 }
  0xc3   :  { %v239_v32 = vadd.f32 %v4340_v30, %v238_v31  ;;  %v4112_v30 = vld [vmem:[#allocation2 + $0x188] sm:$0xff]  ;;  %v4111_v31 = vld [vmem:[#allocation2 + $0x180] sm:$0xff] }
  0xc4   :  { %745 = vmatpush.bf16.msrb.mxu2 %v4112_v30 }
  0xc5   :  { %v242_v33 = vmax.f32 %v239_v32, 0.0  ;;  %v4126_v32 = vld [vmem:[#allocation2 + $0x1f8] sm:$0xff] }
  0xc6   :  { %824 = vmatpush.bf16.msrb.mxu3 %v4126_v32 }
  0xc7   :  { %v243_v34 = vpack.c.bf16 %v242_v33, %v242_v33  ;;  %v4125_v33 = vld [vmem:[#allocation2 + $0x1f0] sm:$0xff] }
  0xc8   :  { %746 = vmatpush.bf16.msrb.mxu2 %v4111_v31 }
  0xc9   :  { %322 = vmatmul.bf16.vlgmr.msra.gmra.mxu1 %v243_v34  ;;  %v4124_v34 = vld [vmem:[#allocation2 + $0x1e8] sm:$0xff] }
  0xca   :  { %v240_v35 = vpop.f32.mrf.mxu0  ;;  %825 = vmatpush.bf16.msrb.mxu3 %v4125_v33 }
  0xcb   :  { %v4123_v35 = vld [vmem:[#allocation2 + $0x1e0] sm:$0xff] }
  0xce   :  { %826 = vmatpush.bf16.msrb.mxu3 %v4124_v34 }
  0xd2   :  { %827 = vmatpush.bf16.msrb.mxu3 %v4123_v35 }
  0xd6   :  { %828 = vmatpush.bf16.msrb.mxu3 %v4122_v36 }
  0xda   :  { %829 = vmatpush.bf16.msrb.mxu3 %v4121_v37 }
 0x146   :  { %v323_v45 = vpop.f32.mrf.mxu1 }
 0x147   :  { %v324_v46 = vadd.f32 %v4341_v44, %v323_v45  ;;  %v4120_v44 = vld [vmem:[#allocation2 + $0x1c8] sm:$0xff]  ;;  %v4119_v45 = vld [vmem:[#allocation2 + $0x1c0] sm:$0xff] }
 0x148   :  { %830 = vmatpush.bf16.msrb.mxu3 %v4120_v44 }
 0x149   :  { %v327_v47 = vmax.f32 %v324_v46, 0.0  ;;  %v4134_v46 = vld [vmem:[#allocation2 + $0x238] sm:$0xff] }
 0x14a   :  { %909 = vmatpush.bf16.msra.mxu0 %v4134_v46 }
 0x14b   :  { %v328_v48 = vpack.c.bf16 %v327_v47, %v327_v47  ;;  %v4133_v47 = vld [vmem:[#allocation2 + $0x230] sm:$0xff] }
 0x14c   :  { %831 = vmatpush.bf16.msrb.mxu3 %v4119_v45 }
 0x14d   :  { %407 = vmatmul.bf16.vlgmr.msra.gmra.mxu2 %v328_v48  ;;  %v4132_v48 = vld [vmem:[#allocation2 + $0x228] sm:$0xff] }
 0x14e   :  { %v325_v49 = vpop.f32.mrf.mxu1  ;;  %910 = vmatpush.bf16.msra.mxu0 %v4133_v47 }
 0x14f   :  { %v4131_v49 = vld [vmem:[#allocation2 + $0x220] sm:$0xff] }
 0x152   :  { %911 = vmatpush.bf16.msra.mxu0 %v4132_v48 }
 0x156   :  { %912 = vmatpush.bf16.msra.mxu0 %v4131_v49 }
 0x15a   :  { %913 = vmatpush.bf16.msra.mxu0 %v4130_v50 }
 0x15e   :  { %914 = vmatpush.bf16.msra.mxu0 %v4129_v51 }
 0x1d0   :  { %v408_v59 = vpop.f32.mrf.mxu2 }
 0x1d1   :  { %v409_v60 = vadd.f32 %v4342_v58, %v408_v59  ;;  %v4128_v58 = vld [vmem:[#allocation2 + $0x208] sm:$0xff]  ;;  %v4127_v59 = vld [vmem:[#allocation2 + $0x200] sm:$0xff] }
 0x1d2   :  { %915 = vmatpush.bf16.msra.mxu0 %v4128_v58 }
 0x1d3   :  { %v412_v61 = vmax.f32 %v409_v60, 0.0  ;;  %v4142_v60 = vld [vmem:[#allocation2 + $0x278] sm:$0xff] }
 0x1d4   :  { %994 = vmatpush.bf16.msra.mxu1 %v4142_v60 }
 0x1d5   :  { %v413_v62 = vpack.c.bf16 %v412_v61, %v412_v61  ;;  %v4141_v61 = vld [vmem:[#allocation2 + $0x270] sm:$0xff] }
 0x1d6   :  { %916 = vmatpush.bf16.msra.mxu0 %v4127_v59 }
 0x1d7   :  { %492 = vmatmul.bf16.vlgmr.msra.gmra.mxu3 %v413_v62  ;;  %v4140_v62 = vld [vmem:[#allocation2 + $0x268] sm:$0xff] }
 0x1d8   :  { %v410_v63 = vpop.f32.mrf.mxu2  ;;  %995 = vmatpush.bf16.msra.mxu1 %v4141_v61 }
 0x1d9   :  { %v4139_v63 = vld [vmem:[#allocation2 + $0x260] sm:$0xff] }
 0x1dc   :  { %996 = vmatpush.bf16.msra.mxu1 %v4140_v62 }
 0x1e0   :  { %997 = vmatpush.bf16.msra.mxu1 %v4139_v63 }
 0x1e4   :  { %998 = vmatpush.bf16.msra.mxu1 %v4138_v0 }
 0x1e8   :  { %999 = vmatpush.bf16.msra.mxu1 %v4137_v2 }
 0x25a   :  { %v493_v10 = vpop.f32.mrf.mxu3 }
 0x25b   :  { %v494_v11 = vadd.f32 %v4343_v9, %v493_v10  ;;  %v4136_v9 = vld [vmem:[#allocation2 + $0x248] sm:$0xff]  ;;  %v4135_v10 = vld [vmem:[#allocation2 + $0x240] sm:$0xff] }
 0x25c   :  { %1000 = vmatpush.bf16.msra.mxu1 %v4136_v9 }
 0x25d   :  { %v497_v12 = vmax.f32 %v494_v11, 0.0  ;;  %v4348_v11 = vld [vmem:[#allocation11 + $0x8] ss:$0 sm:$0xff] }
 0x25f   :  { %v498_v14 = vpack.c.bf16 %v497_v12, %v497_v12 }
 0x260   :  { %1001 = vmatpush.bf16.msra.mxu1 %v4135_v10 }
 0x261   :  { %577 = vmatmul.bf16.vlgmr.msrb.gmra.mxu0 %v498_v14 }
 0x262   :  { %v495_v15 = vpop.f32.mrf.mxu3 }
 0x2de   :  { %v578_v25 = vpop.f32.mrf.mxu0 }
 0x2df   :  { %v579_v26 = vadd.f32 %v4344_v24, %v578_v25 }
 0x2e1   :  { %v582_v27 = vmax.f32 %v579_v26, 0.0 }
 0x2e3   :  { %v583_v28 = vpack.c.bf16 %v582_v27, %v582_v27 }
 0x2e5   :  { %662 = vmatmul.bf16.vlgmr.msrb.gmra.mxu1 %v583_v28 }
 0x2e6   :  { %v580_v29 = vpop.f32.mrf.mxu0 }
 0x362   :  { %v663_v39 = vpop.f32.mrf.mxu1 }
 0x363   :  { %v664_v40 = vadd.f32 %v4345_v38, %v663_v39 }
 0x365   :  { %v667_v41 = vmax.f32 %v664_v40, 0.0 }
 0x367   :  { %v668_v42 = vpack.c.bf16 %v667_v41, %v667_v41 }
 0x369   :  { %747 = vmatmul.bf16.vlgmr.msrb.gmra.mxu2 %v668_v42 }
 0x36a   :  { %v665_v43 = vpop.f32.mrf.mxu1 }
 0x3ec   :  { %v748_v53 = vpop.f32.mrf.mxu2 }
 0x3ed   :  { %v749_v54 = vadd.f32 %v4346_v52, %v748_v53 }
 0x3ef   :  { %v752_v55 = vmax.f32 %v749_v54, 0.0 }
 0x3f1   :  { %v753_v56 = vpack.c.bf16 %v752_v55, %v752_v55 }
 0x3f3   :  { %832 = vmatmul.bf16.vlgmr.msrb.gmra.mxu3 %v753_v56 }
 0x3f4   :  { %v750_v57 = vpop.f32.mrf.mxu2 }
 0x476   :  { %v833_v4 = vpop.f32.mrf.mxu3 }
 0x477   :  { %v834_v5 = vadd.f32 %v4347_v3, %v833_v4 }
 0x479   :  { %v837_v6 = vmax.f32 %v834_v5, 0.0 }
 0x47b   :  { %v838_v7 = vpack.c.bf16 %v837_v6, %v837_v6 }
 0x47d   :  { %917 = vmatmul.bf16.vlgmr.msra.gmra.mxu0 %v838_v7 }
 0x47e   :  { %v835_v8 = vpop.f32.mrf.mxu3 }
 0x4fa   :  { %v918_v12 = vpop.f32.mrf.mxu0 }
 0x4fb   :  { %v919_v14 = vadd.f32 %v4348_v11, %v918_v12 }
 0x4fd   :  { %v922_v15 = vmax.f32 %v919_v14, 0.0 }
 0x4ff   :  { %v923_v16 = vpack.c.bf16 %v922_v15, %v922_v15 }
 0x501   :  { %1002 = vmatmul.bf16.vlgmr.msra.gmra.mxu1 %v923_v16 }
 0x502   :  { %v920_v17 = vpop.f32.mrf.mxu0 }
 0x57e   :  { %v1003_v19 = vpop.f32.mrf.mxu1 }
 0x57f   :  { %v1004_v20 = vadd.f32 %v4349_v18, %v1003_v19 }
 0x581   :  { %v1007_v21 = vmax.f32 %v1004_v20, 0.0 }
 0x583   :  { %v4671_v22 = vpack.c.bf16 %v1007_v21, %v1007_v21 }
 0x586   :  { %v1005_v23 = vpop.f32.mrf.mxu1 }
 0x587   :  { %4573 = dma.done.wait [#allocation4 + $0x1], 10240 }
 0x588   :  { %4574 = vsyncadd [#allocation4 + $0x1], 4294957056  ;;  %1866 = vst [vmem:[#allocation3] sm:$0xf] %v4586_v1  ;;  %v1867_v24 = vld [vmem:[#allocation10] sm:$0xff]  ;;  %vm1869_vm2 = vcmask 60416  }
 0x589   :  { %v4150_v25 = vld [vmem:[#allocation2 + $0x2b8] sm:$0xff]  ;;  %v1868_v26 = vpack.c.bf16 %v1867_v24, %v1867_v24  ;;  %v4149_v27 = vld [vmem:[#allocation2 + $0x2b0] sm:$0xff]  ;;  %v4148_v29 = vld [vmem:[#allocation2 + $0x2a8] sm:$0xff] }
 0x58a   :  { %1086 = vmatpush.bf16.msra.mxu2 %v4150_v25  ;;  %v4158_v28 = vld [vmem:[#allocation2 + $0x2f8] sm:$0xff]  ;;  %v4157_v30 = vld [vmem:[#allocation2 + $0x2f0] sm:$0xff]  ;;  %v4156_v31 = vld [vmem:[#allocation2 + $0x2e8] sm:$0xff] }
 0x58b   :  { %1870 = vst.msk [vmem:[#allocation3] sm:$0xf] %vm1869_vm2, %v1868_v26  ;;  %1171 = vmatpush.bf16.msra.mxu3 %v4158_v28  ;;  %v4147_v33 = vld [vmem:[#allocation2 + $0x2a0] sm:$0xff]  ;;  %v4146_v34 = vld [vmem:[#allocation2 + $0x298] sm:$0xff]  ;;  %v4145_v36 = vld [vmem:[#allocation2 + $0x290] sm:$0xff] }
 0x58c   :  { %v4155_v1 = vld [vmem:[#allocation2 + $0x2e0] sm:$0xff]  ;;  %v4154_v35 = vld [vmem:[#allocation2 + $0x2d8] sm:$0xff]  ;;  %v4153_v37 = vld [vmem:[#allocation2 + $0x2d0] sm:$0xff] }
 0x58d   :  { %v4144_v38 = vld [vmem:[#allocation2 + $0x288] sm:$0xff]  ;;  %v4143_v39 = vld [vmem:[#allocation2 + $0x280] sm:$0xff]  ;;  %v4166_v42 = vld [vmem:[#allocation2 + $0x338] sm:$0xff] }
 0x58e   :  { %1087 = vmatpush.bf16.msra.mxu2 %v4149_v27  ;;  %v4152_v40 = vld [vmem:[#allocation2 + $0x2c8] sm:$0xff]  ;;  %v4151_v41 = vld [vmem:[#allocation2 + $0x2c0] sm:$0xff]  ;;  %1256 = vmatpush.bf16.msrb.mxu0 %v4166_v42  ;;  %v4165_v43 = vld [vmem:[#allocation2 + $0x330] sm:$0xff] }
 0x58f   :  { %1172 = vmatpush.bf16.msra.mxu3 %v4157_v30  ;;  %v4164_v44 = vld [vmem:[#allocation2 + $0x328] sm:$0xff]  ;;  %v4163_v45 = vld [vmem:[#allocation2 + $0x320] sm:$0xff]  ;;  %v4162_v46 = vld [vmem:[#allocation2 + $0x318] sm:$0xff] }
 0x590   :  { %v4161_v47 = vld [vmem:[#allocation2 + $0x310] sm:$0xff]  ;;  %v4350_v48 = vld [vmem:[#allocation11 + $0xa] ss:$0 sm:$0xff]  ;;  %v4160_v53 = vld [vmem:[#allocation2 + $0x308] sm:$0xff] }
 0x591   :  { %v4159_v54 = vld [vmem:[#allocation2 + $0x300] sm:$0xff]  ;;  %v4174_v55 = vld [vmem:[#allocation2 + $0x378] sm:$0xff]  ;;  %v4173_v56 = vld [vmem:[#allocation2 + $0x370] sm:$0xff] }
 0x592   :  { %v4674_v32 = vld [vmem:[#allocation3] sm:$0xf]  ;;  %1088 = vmatpush.bf16.msra.mxu2 %v4148_v29  ;;  %1257 = vmatpush.bf16.msrb.mxu0 %v4165_v43  ;;  %v4172_v57 = vld [vmem:[#allocation2 + $0x368] sm:$0xff]  ;;  %v4170_v59 = vld [vmem:[#allocation2 + $0x358] sm:$0xff] }
 0x593   :  { %1173 = vmatpush.bf16.msra.mxu3 %v4156_v31  ;;  %1341 = vmatpush.bf16.msrb.mxu1 %v4174_v55  ;;  %v4171_v58 = vld [vmem:[#allocation2 + $0x360] sm:$0xff]  ;;  %v4169_v60 = vld [vmem:[#allocation2 + $0x350] sm:$0xff]  ;;  %v4351_v61 = vld [vmem:[#allocation11 + $0xb] ss:$0 sm:$0xff] }
 0x594   :  { %v4168_v4 = vld [vmem:[#allocation2 + $0x348] sm:$0xff]  ;;  %v4167_v5 = vld [vmem:[#allocation2 + $0x340] sm:$0xff]  ;;  %v4182_v6 = vld [vmem:[#allocation2 + $0x3b8] sm:$0xff] }
 0x595   :  { %v4181_v7 = vld [vmem:[#allocation2 + $0x3b0] sm:$0xff]  ;;  %v4180_v8 = vld [vmem:[#allocation2 + $0x3a8] sm:$0xff]  ;;  %v4179_v9 = vld [vmem:[#allocation2 + $0x3a0] sm:$0xff] }
 0x596   :  { %1089 = vmatpush.bf16.msra.mxu2 %v4147_v33  ;;  %1258 = vmatpush.bf16.msrb.mxu0 %v4164_v44  ;;  %v4178_v10 = vld [vmem:[#allocation2 + $0x398] sm:$0xff]  ;;  %v4177_v11 = vld [vmem:[#allocation2 + $0x390] sm:$0xff]  ;;  %v4352_v12 = vld [vmem:[#allocation11 + $0xc] ss:$0 sm:$0xff] }
 0x597   :  { %1174 = vmatpush.bf16.msra.mxu3 %v4155_v1  ;;  %1342 = vmatpush.bf16.msrb.mxu1 %v4173_v56  ;;  %v4176_v19 = vld [vmem:[#allocation2 + $0x388] sm:$0xff]  ;;  %v4175_v20 = vld [vmem:[#allocation2 + $0x380] sm:$0xff]  ;;  %v4190_v21 = vld [vmem:[#allocation2 + $0x3f8] sm:$0xff] }
 0x598   :  { %v4189_v23 = vld [vmem:[#allocation2 + $0x3f0] sm:$0xff]  ;;  %v4188_v24 = vld [vmem:[#allocation2 + $0x3e8] sm:$0xff]  ;;  %v4187_v25 = vld [vmem:[#allocation2 + $0x3e0] sm:$0xff] }
 0x599   :  { %v4186_v26 = vld [vmem:[#allocation2 + $0x3d8] sm:$0xff]  ;;  %v4185_v27 = vld [vmem:[#allocation2 + $0x3d0] sm:$0xff]  ;;  %v4353_v28 = vld [vmem:[#allocation11 + $0xd] ss:$0 sm:$0xff] }
 0x59a   :  { %1090 = vmatpush.bf16.msra.mxu2 %v4146_v34  ;;  %1259 = vmatpush.bf16.msrb.mxu0 %v4163_v45  ;;  %v4184_v34 = vld [vmem:[#allocation2 + $0x3c8] sm:$0xff] }
 0x59b   :  { %1175 = vmatpush.bf16.msra.mxu3 %v4154_v35  ;;  %1343 = vmatpush.bf16.msrb.mxu1 %v4172_v57  ;;  %v4183_v35 = vld [vmem:[#allocation2 + $0x3c0] sm:$0xff]  ;;  %v4354_v42 = vld [vmem:[#allocation11 + $0xe] ss:$0 sm:$0xff]  ;;  %v4355_v55 = vld [vmem:[#allocation11 + $0xf] ss:$0 sm:$0xff] }
 0x59e   :  { %1091 = vmatpush.bf16.msra.mxu2 %v4145_v36  ;;  %1260 = vmatpush.bf16.msrb.mxu0 %v4162_v46  ;;  %v4198_v36 = vld [vmem:[#allocation2 + $0x438] sm:$0xff] }
 0x59f   :  { %1176 = vmatpush.bf16.msra.mxu3 %v4153_v37  ;;  %1344 = vmatpush.bf16.msrb.mxu1 %v4171_v58  ;;  %v4197_v37 = vld [vmem:[#allocation2 + $0x430] sm:$0xff] }
 0x5a2   :  { %1092 = vmatpush.bf16.msra.mxu2 %v4144_v38  ;;  %1261 = vmatpush.bf16.msrb.mxu0 %v4161_v47  ;;  %v4196_v38 = vld [vmem:[#allocation2 + $0x428] sm:$0xff] }
 0x5a3   :  { %1177 = vmatpush.bf16.msra.mxu3 %v4152_v40  ;;  %1345 = vmatpush.bf16.msrb.mxu1 %v4170_v59  ;;  %v4194_v40 = vld [vmem:[#allocation2 + $0x418] sm:$0xff] }
 0x5a6   :  { %1093 = vmatpush.bf16.msra.mxu2 %v4143_v39  ;;  %1262 = vmatpush.bf16.msrb.mxu0 %v4160_v53  ;;  %v4195_v39 = vld [vmem:[#allocation2 + $0x420] sm:$0xff]  ;;  %v4202_v53 = vld [vmem:[#allocation2 + $0x458] sm:$0xff] }
 0x5a7   :  { %1178 = vmatpush.bf16.msra.mxu3 %v4151_v41  ;;  %1346 = vmatpush.bf16.msrb.mxu1 %v4169_v60  ;;  %v4193_v41 = vld [vmem:[#allocation2 + $0x410] sm:$0xff] }
 0x5a9   :  { %1094 = vmatmul.bf16.vlgmr.msra.gmra.mxu2 %v4669_v13 }
 0x5aa   :  { %1263 = vmatpush.bf16.msrb.mxu0 %v4159_v54  ;;  %1426 = vmatpush.bf16.msrb.mxu2 %v4182_v6  ;;  %v4201_v54 = vld [vmem:[#allocation2 + $0x450] sm:$0xff]  ;;  %v4356_v6 = vld [vmem:[#allocation11 + $0x10] ss:$0 sm:$0xff] }
 0x5ab   :  { %1347 = vmatpush.bf16.msrb.mxu1 %v4168_v4  ;;  %1511 = vmatpush.bf16.msrb.mxu3 %v4190_v21  ;;  %v4210_v4 = vld [vmem:[#allocation2 + $0x498] sm:$0xff]  ;;  %v4357_v21 = vld [vmem:[#allocation11 + $0x11] ss:$0 sm:$0xff] }
 0x5ae   :  { %1427 = vmatpush.bf16.msrb.mxu2 %v4181_v7  ;;  %1596 = vmatpush.bf16.msra.mxu0 %v4198_v36  ;;  %v4359_v36 = vld [vmem:[#allocation11 + $0x13] ss:$0 sm:$0xff] }
 0x5af   :  { %1348 = vmatpush.bf16.msrb.mxu1 %v4167_v5  ;;  %1512 = vmatpush.bf16.msrb.mxu3 %v4189_v23  ;;  %v4209_v5 = vld [vmem:[#allocation2 + $0x490] sm:$0xff] }
 0x5b2   :  { %1428 = vmatpush.bf16.msrb.mxu2 %v4180_v8  ;;  %1597 = vmatpush.bf16.msra.mxu0 %v4197_v37 }
 0x5b3   :  { %1513 = vmatpush.bf16.msrb.mxu3 %v4188_v24 }
 0x5b6   :  { %1429 = vmatpush.bf16.msrb.mxu2 %v4179_v9  ;;  %1598 = vmatpush.bf16.msra.mxu0 %v4196_v38 }
 0x5b7   :  { %1514 = vmatpush.bf16.msrb.mxu3 %v4187_v25 }
 0x5ba   :  { %1430 = vmatpush.bf16.msrb.mxu2 %v4178_v10  ;;  %1599 = vmatpush.bf16.msra.mxu0 %v4195_v39 }
 0x5bb   :  { %1515 = vmatpush.bf16.msrb.mxu3 %v4186_v26 }
 0x5be   :  { %1431 = vmatpush.bf16.msrb.mxu2 %v4177_v11  ;;  %1600 = vmatpush.bf16.msra.mxu0 %v4194_v40 }
 0x5bf   :  { %1516 = vmatpush.bf16.msrb.mxu3 %v4185_v27 }
 0x5c2   :  { %1432 = vmatpush.bf16.msrb.mxu2 %v4176_v19  ;;  %1601 = vmatpush.bf16.msra.mxu0 %v4193_v41  ;;  %v4218_v19 = vld [vmem:[#allocation2 + $0x4d8] sm:$0xff] }
 0x5c3   :  { %1517 = vmatpush.bf16.msrb.mxu3 %v4184_v34 }
 0x5c6   :  { %1433 = vmatpush.bf16.msrb.mxu2 %v4175_v20  ;;  %v4217_v20 = vld [vmem:[#allocation2 + $0x4d0] sm:$0xff] }
 0x5c7   :  { %1518 = vmatpush.bf16.msrb.mxu3 %v4183_v35 }
 0x62c   :  { %v1095_v49 = vpop.f32.mrf.mxu2 }
 0x62d   :  { %v1096_v50 = vadd.f32 %v4350_v48, %v1095_v49  ;;  %v4192_v48 = vld [vmem:[#allocation2 + $0x408] sm:$0xff]  ;;  %v4191_v49 = vld [vmem:[#allocation2 + $0x400] sm:$0xff] }
 0x62e   :  { %1602 = vmatpush.bf16.msra.mxu0 %v4192_v48 }
 0x62f   :  { %v1099_v13 = vmax.f32 %v1096_v50, 0.0  ;;  %v4206_v50 = vld [vmem:[#allocation2 + $0x478] sm:$0xff] }
 0x630   :  { %1681 = vmatpush.bf16.msra.mxu1 %v4206_v50 }
 0x631   :  { %v1100_v51 = vpack.c.bf16 %v1099_v13, %v1099_v13  ;;  %v4205_v13 = vld [vmem:[#allocation2 + $0x470] sm:$0xff] }
 0x632   :  { %1603 = vmatpush.bf16.msra.mxu0 %v4191_v49 }
 0x633   :  { %1179 = vmatmul.bf16.vlgmr.msra.gmra.mxu3 %v1100_v51  ;;  %v4204_v51 = vld [vmem:[#allocation2 + $0x468] sm:$0xff] }
 0x634   :  { %v1097_v52 = vpop.f32.mrf.mxu2  ;;  %1682 = vmatpush.bf16.msra.mxu1 %v4205_v13 }
 0x635   :  { %v4203_v52 = vld [vmem:[#allocation2 + $0x460] sm:$0xff] }
 0x638   :  { %1683 = vmatpush.bf16.msra.mxu1 %v4204_v51 }
 0x63c   :  { %1684 = vmatpush.bf16.msra.mxu1 %v4203_v52 }
 0x640   :  { %1685 = vmatpush.bf16.msra.mxu1 %v4202_v53 }
 0x644   :  { %1686 = vmatpush.bf16.msra.mxu1 %v4201_v54 }
 0x6b6   :  { %v1180_v62 = vpop.f32.mrf.mxu3 }
 0x6b7   :  { %v1181_v63 = vadd.f32 %v4351_v61, %v1180_v62  ;;  %v4200_v61 = vld [vmem:[#allocation2 + $0x448] sm:$0xff]  ;;  %v4199_v62 = vld [vmem:[#allocation2 + $0x440] sm:$0xff] }
 0x6b8   :  { %1687 = vmatpush.bf16.msra.mxu1 %v4200_v61 }
 0x6b9   :  { %v1184_v0 = vmax.f32 %v1181_v63, 0.0  ;;  %v4214_v63 = vld [vmem:[#allocation2 + $0x4b8] sm:$0xff] }
 0x6ba   :  { %1766 = vmatpush.bf16.msra.mxu2 %v4214_v63 }
 0x6bb   :  { %v1185_v2 = vpack.c.bf16 %v1184_v0, %v1184_v0  ;;  %v4213_v0 = vld [vmem:[#allocation2 + $0x4b0] sm:$0xff] }
 0x6bc   :  { %1688 = vmatpush.bf16.msra.mxu1 %v4199_v62 }
 0x6bd   :  { %1264 = vmatmul.bf16.vlgmr.msrb.gmra.mxu0 %v1185_v2  ;;  %v4212_v2 = vld [vmem:[#allocation2 + $0x4a8] sm:$0xff] }
 0x6be   :  { %v1182_v3 = vpop.f32.mrf.mxu3  ;;  %1767 = vmatpush.bf16.msra.mxu2 %v4213_v0 }
 0x6bf   :  { %v4211_v3 = vld [vmem:[#allocation2 + $0x4a0] sm:$0xff] }
 0x6c2   :  { %1768 = vmatpush.bf16.msra.mxu2 %v4212_v2 }
 0x6c6   :  { %1769 = vmatpush.bf16.msra.mxu2 %v4211_v3 }
 0x6ca   :  { %1770 = vmatpush.bf16.msra.mxu2 %v4210_v4 }
 0x6ce   :  { %1771 = vmatpush.bf16.msra.mxu2 %v4209_v5 }
 0x73a   :  { %v1265_v14 = vpop.f32.mrf.mxu0 }
 0x73b   :  { %v1266_v15 = vadd.f32 %v4352_v12, %v1265_v14  ;;  %v4208_v12 = vld [vmem:[#allocation2 + $0x488] sm:$0xff]  ;;  %v4207_v14 = vld [vmem:[#allocation2 + $0x480] sm:$0xff] }
 0x73c   :  { %1772 = vmatpush.bf16.msra.mxu2 %v4208_v12 }
 0x73d   :  { %v1269_v16 = vmax.f32 %v1266_v15, 0.0  ;;  %v4222_v15 = vld [vmem:[#allocation2 + $0x4f8] sm:$0xff] }
 0x73e   :  { %1851 = vmatpush.bf16.msra.mxu3 %v4222_v15 }
 0x73f   :  { %v1270_v17 = vpack.c.bf16 %v1269_v16, %v1269_v16  ;;  %v4221_v16 = vld [vmem:[#allocation2 + $0x4f0] sm:$0xff] }
 0x740   :  { %1773 = vmatpush.bf16.msra.mxu2 %v4207_v14 }
 0x741   :  { %1349 = vmatmul.bf16.vlgmr.msrb.gmra.mxu1 %v1270_v17  ;;  %v4220_v17 = vld [vmem:[#allocation2 + $0x4e8] sm:$0xff] }
 0x742   :  { %v1267_v18 = vpop.f32.mrf.mxu0  ;;  %1852 = vmatpush.bf16.msra.mxu3 %v4221_v16 }
 0x743   :  { %v4219_v18 = vld [vmem:[#allocation2 + $0x4e0] sm:$0xff] }
 0x746   :  { %1853 = vmatpush.bf16.msra.mxu3 %v4220_v17 }
 0x74a   :  { %1854 = vmatpush.bf16.msra.mxu3 %v4219_v18 }
 0x74e   :  { %1855 = vmatpush.bf16.msra.mxu3 %v4218_v19 }
 0x752   :  { %1856 = vmatpush.bf16.msra.mxu3 %v4217_v20 }
 0x7be   :  { %v1350_v29 = vpop.f32.mrf.mxu1 }
 0x7bf   :  { %v1351_v30 = vadd.f32 %v4353_v28, %v1350_v29  ;;  %v4216_v28 = vld [vmem:[#allocation2 + $0x4c8] sm:$0xff]  ;;  %v4215_v29 = vld [vmem:[#allocation2 + $0x4c0] sm:$0xff] }
 0x7c0   :  { %1857 = vmatpush.bf16.msra.mxu3 %v4216_v28 }
 0x7c1   :  { %v1354_v31 = vmax.f32 %v1351_v30, 0.0  ;;  %v4358_v30 = vld [vmem:[#allocation11 + $0x12] ss:$0 sm:$0xff] }
 0x7c3   :  { %v1355_v33 = vpack.c.bf16 %v1354_v31, %v1354_v31 }
 0x7c4   :  { %1858 = vmatpush.bf16.msra.mxu3 %v4215_v29 }
 0x7c5   :  { %1434 = vmatmul.bf16.vlgmr.msrb.gmra.mxu2 %v1355_v33 }
 0x7c6   :  { %v1352_v1 = vpop.f32.mrf.mxu1 }
 0x848   :  { %v1435_v43 = vpop.f32.mrf.mxu2 }
 0x849   :  { %v1436_v44 = vadd.f32 %v4354_v42, %v1435_v43 }
 0x84b   :  { %v1439_v45 = vmax.f32 %v1436_v44, 0.0 }
 0x84d   :  { %v1440_v46 = vpack.c.bf16 %v1439_v45, %v1439_v45 }
 0x84f   :  { %1519 = vmatmul.bf16.vlgmr.msrb.gmra.mxu3 %v1440_v46 }
 0x850   :  { %v1437_v47 = vpop.f32.mrf.mxu2 }
 0x8d2   :  { %v1520_v56 = vpop.f32.mrf.mxu3 }
 0x8d3   :  { %v1521_v57 = vadd.f32 %v4355_v55, %v1520_v56 }
 0x8d5   :  { %v1524_v58 = vmax.f32 %v1521_v57, 0.0 }
 0x8d7   :  { %v1525_v59 = vpack.c.bf16 %v1524_v58, %v1524_v58 }
 0x8d9   :  { %1604 = vmatmul.bf16.vlgmr.msra.gmra.mxu0 %v1525_v59 }
 0x8da   :  { %v1522_v60 = vpop.f32.mrf.mxu3 }
 0x956   :  { %v1605_v7 = vpop.f32.mrf.mxu0 }
 0x957   :  { %v1606_v8 = vadd.f32 %v4356_v6, %v1605_v7 }
 0x959   :  { %v1609_v9 = vmax.f32 %v1606_v8, 0.0 }
 0x95b   :  { %v1610_v10 = vpack.c.bf16 %v1609_v9, %v1609_v9 }
 0x95d   :  { %1689 = vmatmul.bf16.vlgmr.msra.gmra.mxu1 %v1610_v10 }
 0x95e   :  { %v1607_v11 = vpop.f32.mrf.mxu0 }
 0x9da   :  { %v1690_v23 = vpop.f32.mrf.mxu1 }
 0x9db   :  { %v1691_v24 = vadd.f32 %v4357_v21, %v1690_v23 }
 0x9dd   :  { %v1694_v25 = vmax.f32 %v1691_v24, 0.0 }
 0x9df   :  { %v1695_v26 = vpack.c.bf16 %v1694_v25, %v1694_v25 }
 0x9e1   :  { %1774 = vmatmul.bf16.vlgmr.msra.gmra.mxu2 %v1695_v26 }
 0x9e2   :  { %v1692_v27 = vpop.f32.mrf.mxu1 }
 0xa64   :  { %v1775_v31 = vpop.f32.mrf.mxu2 }
 0xa65   :  { %v1776_v33 = vadd.f32 %v4358_v30, %v1775_v31 }
 0xa67   :  { %v1779_v1 = vmax.f32 %v1776_v33, 0.0 }
 0xa69   :  { %v1780_v34 = vpack.c.bf16 %v1779_v1, %v1779_v1 }
 0xa6b   :  { %1859 = vmatmul.bf16.vlgmr.msra.gmra.mxu3 %v1780_v34 }
 0xa6c   :  { %v1777_v35 = vpop.f32.mrf.mxu2 }
 0xaee   :  { %v1860_v37 = vpop.f32.mrf.mxu3 }
 0xaef   :  { %v1861_v38 = vadd.f32 %v4359_v36, %v1860_v37 }
 0xaf1   :  { %v1864_v39 = vmax.f32 %v1861_v38, 0.0 }
 0xaf3   :  { %v4677_v40 = vpack.c.bf16 %v1864_v39, %v1864_v39 }
 0xaf6   :  { %v1862_v41 = vpop.f32.mrf.mxu3 }
 0xaf7   :  { %4575 = dma.done.wait [#allocation4 + $0x2], 10240 }
 0xaf8   :  { %4576 = vsyncadd [#allocation4 + $0x2], 4294957056  ;;  %v4230_v42 = vld [vmem:[#allocation2 + $0x538] sm:$0xff]  ;;  %v4229_v43 = vld [vmem:[#allocation2 + $0x530] sm:$0xff]  ;;  %vm2975_vm3 = vcmask 7168  }
 0xaf9   :  { %1943 = vmatpush.bf16.msrb.mxu0 %v4230_v42  ;;  %v4238_v44 = vld [vmem:[#allocation2 + $0x578] sm:$0xff]  ;;  %v4237_v45 = vld [vmem:[#allocation2 + $0x570] sm:$0xff]  ;;  %v4228_v46 = vld [vmem:[#allocation2 + $0x528] sm:$0xff] }
 0xafa   :  { %2028 = vmatpush.bf16.msrb.mxu1 %v4238_v44  ;;  %v4236_v47 = vld [vmem:[#allocation2 + $0x568] sm:$0xff]  ;;  %v4227_v48 = vld [vmem:[#allocation2 + $0x520] sm:$0xff]  ;;  %v4226_v50 = vld [vmem:[#allocation2 + $0x518] sm:$0xff] }
 0xafb   :  { %v4235_v49 = vld [vmem:[#allocation2 + $0x560] sm:$0xff]  ;;  %v4234_v13 = vld [vmem:[#allocation2 + $0x558] sm:$0xff]  ;;  %v4225_v51 = vld [vmem:[#allocation2 + $0x510] sm:$0xff] }
 0xafc   :  { %v4233_v52 = vld [vmem:[#allocation2 + $0x550] sm:$0xff]  ;;  %v4224_v53 = vld [vmem:[#allocation2 + $0x508] sm:$0xff]  ;;  %v4223_v54 = vld [vmem:[#allocation2 + $0x500] sm:$0xff] }
 0xafd   :  { %1944 = vmatpush.bf16.msrb.mxu0 %v4229_v43  ;;  %v4232_v55 = vld [vmem:[#allocation2 + $0x548] sm:$0xff]  ;;  %v4231_v56 = vld [vmem:[#allocation2 + $0x540] sm:$0xff]  ;;  %v4246_v57 = vld [vmem:[#allocation2 + $0x5b8] sm:$0xff] }
 0xafe   :  { %2029 = vmatpush.bf16.msrb.mxu1 %v4237_v45  ;;  %2113 = vmatpush.bf16.msrb.mxu2 %v4246_v57  ;;  %v4245_v58 = vld [vmem:[#allocation2 + $0x5b0] sm:$0xff]  ;;  %v4244_v59 = vld [vmem:[#allocation2 + $0x5a8] sm:$0xff]  ;;  %v4243_v60 = vld [vmem:[#allocation2 + $0x5a0] sm:$0xff] }
 0xaff   :  { %v4242_v61 = vld [vmem:[#allocation2 + $0x598] sm:$0xff]  ;;  %v4241_v62 = vld [vmem:[#allocation2 + $0x590] sm:$0xff]  ;;  %v4240_v5 = vld [vmem:[#allocation2 + $0x588] sm:$0xff] }
 0xb00   :  { %v4360_v63 = vld [vmem:[#allocation11 + $0x14] ss:$0 sm:$0xff]  ;;  %v4239_v6 = vld [vmem:[#allocation2 + $0x580] sm:$0xff]  ;;  %v4254_v7 = vld [vmem:[#allocation2 + $0x5f8] sm:$0xff] }
 0xb01   :  { %1945 = vmatpush.bf16.msrb.mxu0 %v4228_v46  ;;  %2198 = vmatpush.bf16.msrb.mxu3 %v4254_v7  ;;  %v4253_v8 = vld [vmem:[#allocation2 + $0x5f0] sm:$0xff]  ;;  %v4252_v9 = vld [vmem:[#allocation2 + $0x5e8] sm:$0xff]  ;;  %v4251_v10 = vld [vmem:[#allocation2 + $0x5e0] sm:$0xff] }
 0xb02   :  { %2030 = vmatpush.bf16.msrb.mxu1 %v4236_v47  ;;  %2114 = vmatpush.bf16.msrb.mxu2 %v4245_v58  ;;  %v4250_v11 = vld [vmem:[#allocation2 + $0x5d8] sm:$0xff]  ;;  %v4249_v12 = vld [vmem:[#allocation2 + $0x5d0] sm:$0xff]  ;;  %v4248_v20 = vld [vmem:[#allocation2 + $0x5c8] sm:$0xff] }
 0xb03   :  { %v4361_v14 = vld [vmem:[#allocation11 + $0x15] ss:$0 sm:$0xff]  ;;  %v4247_v21 = vld [vmem:[#allocation2 + $0x5c0] sm:$0xff]  ;;  %v4262_v23 = vld [vmem:[#allocation2 + $0x638] sm:$0xff] }
 0xb04   :  { %v4261_v24 = vld [vmem:[#allocation2 + $0x630] sm:$0xff]  ;;  %v4260_v25 = vld [vmem:[#allocation2 + $0x628] sm:$0xff]  ;;  %v4259_v26 = vld [vmem:[#allocation2 + $0x620] sm:$0xff] }
 0xb05   :  { %1946 = vmatpush.bf16.msrb.mxu0 %v4227_v48  ;;  %2199 = vmatpush.bf16.msrb.mxu3 %v4253_v8  ;;  %v4258_v27 = vld [vmem:[#allocation2 + $0x618] sm:$0xff]  ;;  %v4257_v28 = vld [vmem:[#allocation2 + $0x610] sm:$0xff]  ;;  %v4256_v35 = vld [vmem:[#allocation2 + $0x608] sm:$0xff] }
 0xb06   :  { %2031 = vmatpush.bf16.msrb.mxu1 %v4235_v49  ;;  %2115 = vmatpush.bf16.msrb.mxu2 %v4244_v59  ;;  %v4362_v29 = vld [vmem:[#allocation11 + $0x16] ss:$0 sm:$0xff]  ;;  %v4255_v36 = vld [vmem:[#allocation2 + $0x600] sm:$0xff]  ;;  %v4270_v37 = vld [vmem:[#allocation2 + $0x678] sm:$0xff] }
 0xb07   :  { %v4269_v38 = vld [vmem:[#allocation2 + $0x670] sm:$0xff]  ;;  %v4268_v39 = vld [vmem:[#allocation2 + $0x668] sm:$0xff]  ;;  %v4267_v41 = vld [vmem:[#allocation2 + $0x660] sm:$0xff] }
 0xb08   :  { %v4266_v42 = vld [vmem:[#allocation2 + $0x658] sm:$0xff]  ;;  %v4265_v43 = vld [vmem:[#allocation2 + $0x650] sm:$0xff] }
 0xb09   :  { %1947 = vmatpush.bf16.msrb.mxu0 %v4226_v50  ;;  %2200 = vmatpush.bf16.msrb.mxu3 %v4252_v9  ;;  %v4363_v44 = vld [vmem:[#allocation11 + $0x17] ss:$0 sm:$0xff]  ;;  %v4264_v50 = vld [vmem:[#allocation2 + $0x648] sm:$0xff]  ;;  %v4364_v57 = vld [vmem:[#allocation11 + $0x18] ss:$0 sm:$0xff] }
 0xb0a   :  { %2032 = vmatpush.bf16.msrb.mxu1 %v4234_v13  ;;  %2116 = vmatpush.bf16.msrb.mxu2 %v4243_v60  ;;  %v4263_v13 = vld [vmem:[#allocation2 + $0x640] sm:$0xff]  ;;  %v4365_v7 = vld [vmem:[#allocation11 + $0x19] ss:$0 sm:$0xff] }
 0xb0d   :  { %1948 = vmatpush.bf16.msrb.mxu0 %v4225_v51  ;;  %2201 = vmatpush.bf16.msrb.mxu3 %v4251_v10  ;;  %v4278_v51 = vld [vmem:[#allocation2 + $0x6b8] sm:$0xff] }
 0xb0e   :  { %2033 = vmatpush.bf16.msrb.mxu1 %v4233_v52  ;;  %2117 = vmatpush.bf16.msrb.mxu2 %v4242_v61  ;;  %v4277_v52 = vld [vmem:[#allocation2 + $0x6b0] sm:$0xff] }
 0xb11   :  { %1949 = vmatpush.bf16.msrb.mxu0 %v4224_v53  ;;  %2202 = vmatpush.bf16.msrb.mxu3 %v4250_v11  ;;  %v4276_v53 = vld [vmem:[#allocation2 + $0x6a8] sm:$0xff] }
 0xb12   :  { %2034 = vmatpush.bf16.msrb.mxu1 %v4232_v55  ;;  %2118 = vmatpush.bf16.msrb.mxu2 %v4241_v62  ;;  %v4274_v55 = vld [vmem:[#allocation2 + $0x698] sm:$0xff] }
 0xb15   :  { %1950 = vmatpush.bf16.msrb.mxu0 %v4223_v54  ;;  %2203 = vmatpush.bf16.msrb.mxu3 %v4249_v12  ;;  %v4275_v54 = vld [vmem:[#allocation2 + $0x6a0] sm:$0xff] }
 0xb16   :  { %2035 = vmatpush.bf16.msrb.mxu1 %v4231_v56  ;;  %2119 = vmatpush.bf16.msrb.mxu2 %v4240_v5  ;;  %v4273_v56 = vld [vmem:[#allocation2 + $0x690] sm:$0xff]  ;;  %v4282_v5 = vld [vmem:[#allocation2 + $0x6d8] sm:$0xff] }
 0xb18   :  { %1951 = vmatmul.bf16.vlgmr.msrb.gmra.mxu0 %v4674_v32 }
 0xb19   :  { %2204 = vmatpush.bf16.msrb.mxu3 %v4248_v20  ;;  %2283 = vmatpush.bf16.msra.mxu0 %v4262_v23  ;;  %v4290_v20 = vld [vmem:[#allocation2 + $0x718] sm:$0xff]  ;;  %v4366_v23 = vld [vmem:[#allocation11 + $0x1a] ss:$0 sm:$0xff] }
 0xb1a   :  { %2120 = vmatpush.bf16.msrb.mxu2 %v4239_v6  ;;  %2368 = vmatpush.bf16.msra.mxu1 %v4270_v37  ;;  %v4281_v6 = vld [vmem:[#allocation2 + $0x6d0] sm:$0xff]  ;;  %v4367_v37 = vld [vmem:[#allocation11 + $0x1b] ss:$0 sm:$0xff] }
 0xb1d   :  { %2205 = vmatpush.bf16.msrb.mxu3 %v4247_v21  ;;  %2284 = vmatpush.bf16.msra.mxu0 %v4261_v24  ;;  %v4289_v21 = vld [vmem:[#allocation2 + $0x710] sm:$0xff] }
 0xb1e   :  { %2369 = vmatpush.bf16.msra.mxu1 %v4269_v38  ;;  %2453 = vmatpush.bf16.msra.mxu2 %v4278_v51  ;;  %v4316_v51 = vld [vmem:[#allocation13 + $0x68] sm:$0xff] }
 0xb21   :  { %2285 = vmatpush.bf16.msra.mxu0 %v4260_v25 }
 0xb22   :  { %2370 = vmatpush.bf16.msra.mxu1 %v4268_v39  ;;  %2454 = vmatpush.bf16.msra.mxu2 %v4277_v52  ;;  %v4308_v52 = vld [vmem:[#allocation13 + $0x28] sm:$0xff] }
 0xb25   :  { %2286 = vmatpush.bf16.msra.mxu0 %v4259_v26 }
 0xb26   :  { %2371 = vmatpush.bf16.msra.mxu1 %v4267_v41  ;;  %2455 = vmatpush.bf16.msra.mxu2 %v4276_v53  ;;  %v4324_v53 = vld [vmem:[#allocation13 + $0xa8] sm:$0xff] }
 0xb29   :  { %2287 = vmatpush.bf16.msra.mxu0 %v4258_v27 }
 0xb2a   :  { %2372 = vmatpush.bf16.msra.mxu1 %v4266_v42  ;;  %2456 = vmatpush.bf16.msra.mxu2 %v4275_v54  ;;  %v4315_v54 = vld [vmem:[#allocation13 + $0x60] sm:$0xff] }
 0xb2d   :  { %2288 = vmatpush.bf16.msra.mxu0 %v4257_v28 }
 0xb2e   :  { %2373 = vmatpush.bf16.msra.mxu1 %v4265_v43  ;;  %2457 = vmatpush.bf16.msra.mxu2 %v4274_v55  ;;  %v4307_v55 = vld [vmem:[#allocation13 + $0x20] sm:$0xff] }
 0xb31   :  { %2289 = vmatpush.bf16.msra.mxu0 %v4256_v35  ;;  %v4298_v35 = vld [vmem:[#allocation2 + $0x758] sm:$0xff] }
 0xb32   :  { %2374 = vmatpush.bf16.msra.mxu1 %v4264_v50  ;;  %2458 = vmatpush.bf16.msra.mxu2 %v4273_v56  ;;  %v4326_v50 = vld [vmem:[#allocation13 + $0xb8] sm:$0xff]  ;;  %v4323_v56 = vld [vmem:[#allocation13 + $0xa0] sm:$0xff] }
 0xb35   :  { %2290 = vmatpush.bf16.msra.mxu0 %v4255_v36  ;;  %v4297_v36 = vld [vmem:[#allocation2 + $0x750] sm:$0xff] }
 0xb36   :  { %2375 = vmatpush.bf16.msra.mxu1 %v4263_v13  ;;  %v4325_v13 = vld [vmem:[#allocation13 + $0xb0] sm:$0xff] }
 0xb95   :  { %v1952_v0 = vpop.f32.mrf.mxu0 }
 0xb96   :  { %v1953_v2 = vadd.f32 %v4360_v63, %v1952_v0  ;;  %v4272_v63 = vld [vmem:[#allocation2 + $0x688] sm:$0xff]  ;;  %v4271_v0 = vld [vmem:[#allocation2 + $0x680] sm:$0xff] }
 0xb97   :  { %2459 = vmatpush.bf16.msra.mxu2 %v4272_v63  ;;  %v4321_v63 = vld [vmem:[#allocation13 + $0x90] sm:$0xff] }
 0xb98   :  { %v1956_v32 = vmax.f32 %v1953_v2, 0.0  ;;  %v4286_v2 = vld [vmem:[#allocation2 + $0x6f8] sm:$0xff] }
 0xb99   :  { %2538 = vmatpush.bf16.msra.mxu3 %v4286_v2  ;;  %v4304_v2 = vld [vmem:[#allocation13 + $0x8] sm:$0xff] }
 0xb9a   :  { %v1957_v3 = vpack.c.bf16 %v1956_v32, %v1956_v32  ;;  %v4285_v32 = vld [vmem:[#allocation2 + $0x6f0] sm:$0xff] }
 0xb9b   :  { %2460 = vmatpush.bf16.msra.mxu2 %v4271_v0  ;;  %v4312_v0 = vld [vmem:[#allocation13 + $0x48] sm:$0xff] }
 0xb9c   :  { %2036 = vmatmul.bf16.vlgmr.msrb.gmra.mxu1 %v1957_v3  ;;  %v4284_v3 = vld [vmem:[#allocation2 + $0x6e8] sm:$0xff] }
 0xb9d   :  { %v1954_v4 = vpop.f32.mrf.mxu0  ;;  %2539 = vmatpush.bf16.msra.mxu3 %v4285_v32 }
 0xb9e   :  { %v4283_v4 = vld [vmem:[#allocation2 + $0x6e0] sm:$0xff] }
 0xba1   :  { %2540 = vmatpush.bf16.msra.mxu3 %v4284_v3 }
 0xba5   :  { %2541 = vmatpush.bf16.msra.mxu3 %v4283_v4  ;;  %v4311_v4 = vld [vmem:[#allocation13 + $0x40] sm:$0xff] }
 0xba9   :  { %2542 = vmatpush.bf16.msra.mxu3 %v4282_v5  ;;  %v4303_v5 = vld [vmem:[#allocation13] sm:$0xff] }
 0xbad   :  { %2543 = vmatpush.bf16.msra.mxu3 %v4281_v6 }
 0xc19   :  { %v2037_v15 = vpop.f32.mrf.mxu1 }
 0xc1a   :  { %v2038_v16 = vadd.f32 %v4361_v14, %v2037_v15  ;;  %v4280_v14 = vld [vmem:[#allocation2 + $0x6c8] sm:$0xff]  ;;  %v4279_v15 = vld [vmem:[#allocation2 + $0x6c0] sm:$0xff] }
 0xc1b   :  { %2544 = vmatpush.bf16.msra.mxu3 %v4280_v14 }
 0xc1c   :  { %v2041_v17 = vmax.f32 %v2038_v16, 0.0  ;;  %v4294_v16 = vld [vmem:[#allocation2 + $0x738] sm:$0xff] }
 0xc1d   :  { %2623 = vmatpush.bf16.msrb.mxu0 %v4294_v16 }
 0xc1e   :  { %v2042_v18 = vpack.c.bf16 %v2041_v17, %v2041_v17  ;;  %v4293_v17 = vld [vmem:[#allocation2 + $0x730] sm:$0xff] }
 0xc1f   :  { %2545 = vmatpush.bf16.msra.mxu3 %v4279_v15 }
 0xc20   :  { %2121 = vmatmul.bf16.vlgmr.msrb.gmra.mxu2 %v2042_v18  ;;  %v4292_v18 = vld [vmem:[#allocation2 + $0x728] sm:$0xff] }
 0xc21   :  { %v2039_v19 = vpop.f32.mrf.mxu1  ;;  %2624 = vmatpush.bf16.msrb.mxu0 %v4293_v17 }
 0xc22   :  { %v4291_v19 = vld [vmem:[#allocation2 + $0x720] sm:$0xff] }
 0xc25   :  { %2625 = vmatpush.bf16.msrb.mxu0 %v4292_v18 }
 0xc29   :  { %2626 = vmatpush.bf16.msrb.mxu0 %v4291_v19 }
 0xc2d   :  { %2627 = vmatpush.bf16.msrb.mxu0 %v4290_v20 }
 0xc31   :  { %2628 = vmatpush.bf16.msrb.mxu0 %v4289_v21 }
 0xca3   :  { %v2122_v30 = vpop.f32.mrf.mxu2 }
 0xca4   :  { %v2123_v31 = vadd.f32 %v4362_v29, %v2122_v30  ;;  %v4288_v29 = vld [vmem:[#allocation2 + $0x708] sm:$0xff]  ;;  %v4287_v30 = vld [vmem:[#allocation2 + $0x700] sm:$0xff] }
 0xca5   :  { %2629 = vmatpush.bf16.msrb.mxu0 %v4288_v29 }
 0xca6   :  { %v2126_v33 = vmax.f32 %v2123_v31, 0.0  ;;  %v4302_v31 = vld [vmem:[#allocation2 + $0x778] sm:$0xff] }
 0xca7   :  { %2708 = vmatpush.bf16.msrb.mxu1 %v4302_v31 }
 0xca8   :  { %v2127_v1 = vpack.c.bf16 %v2126_v33, %v2126_v33  ;;  %v4301_v33 = vld [vmem:[#allocation2 + $0x770] sm:$0xff] }
 0xca9   :  { %2630 = vmatpush.bf16.msrb.mxu0 %v4287_v30  ;;  %v4372_v30 = vld [vmem:[#allocation5] ss:$0 sm:$0xff] }
 0xcaa   :  { %2206 = vmatmul.bf16.vlgmr.msrb.gmra.mxu3 %v2127_v1  ;;  %v4300_v1 = vld [vmem:[#allocation2 + $0x768] sm:$0xff] }
 0xcab   :  { %v2124_v34 = vpop.f32.mrf.mxu2  ;;  %2709 = vmatpush.bf16.msrb.mxu1 %v4301_v33 }
 0xcac   :  { %v4299_v34 = vld [vmem:[#allocation2 + $0x760] sm:$0xff] }
 0xcaf   :  { %2710 = vmatpush.bf16.msrb.mxu1 %v4300_v1 }
 0xcb3   :  { %2711 = vmatpush.bf16.msrb.mxu1 %v4299_v34 }
 0xcb7   :  { %2712 = vmatpush.bf16.msrb.mxu1 %v4298_v35 }
 0xcbb   :  { %2713 = vmatpush.bf16.msrb.mxu1 %v4297_v36 }
 0xd2d   :  { %v2207_v45 = vpop.f32.mrf.mxu3 }
 0xd2e   :  { %v2208_v46 = vadd.f32 %v4363_v44, %v2207_v45  ;;  %v4296_v44 = vld [vmem:[#allocation2 + $0x748] sm:$0xff]  ;;  %v4295_v45 = vld [vmem:[#allocation2 + $0x740] sm:$0xff] }
 0xd2f   :  { %2714 = vmatpush.bf16.msrb.mxu1 %v4296_v44 }
 0xd30   :  { %v2211_v47 = vmax.f32 %v2208_v46, 0.0  ;;  %v4318_v46 = vld [vmem:[#allocation13 + $0x78] sm:$0xff] }
 0xd31   :  { %2804 = vmatpush.bf16.msrb.mxu2 %v4318_v46 }
 0xd32   :  { %v2212_v48 = vpack.c.bf16 %v2211_v47, %v2211_v47  ;;  %v4310_v47 = vld [vmem:[#allocation13 + $0x38] sm:$0xff] }
 0xd33   :  { %2715 = vmatpush.bf16.msrb.mxu1 %v4295_v45  ;;  %2865 = vmatpush.bf16.msrb.mxu3 %v4310_v47 }
 0xd34   :  { %2291 = vmatmul.bf16.vlgmr.msra.gmra.mxu0 %v2212_v48  ;;  %v4317_v48 = vld [vmem:[#allocation13 + $0x70] sm:$0xff] }
 0xd35   :  { %v2209_v49 = vpop.f32.mrf.mxu3  ;;  %2943 = vmatpush.bf16.msra.mxu0 %v4326_v50  ;;  %2805 = vmatpush.bf16.msrb.mxu2 %v4317_v48 }
 0xd36   :  { %v4309_v49 = vld [vmem:[#allocation13 + $0x30] sm:$0xff] }
 0xd37   :  { %2866 = vmatpush.bf16.msrb.mxu3 %v4309_v49 }
 0xd39   :  { %2944 = vmatpush.bf16.msra.mxu0 %v4325_v13  ;;  %2806 = vmatpush.bf16.msrb.mxu2 %v4316_v51 }
 0xd3b   :  { %2867 = vmatpush.bf16.msrb.mxu3 %v4308_v52 }
 0xd3d   :  { %2945 = vmatpush.bf16.msra.mxu0 %v4324_v53  ;;  %2807 = vmatpush.bf16.msrb.mxu2 %v4315_v54 }
 0xd3f   :  { %2868 = vmatpush.bf16.msrb.mxu3 %v4307_v55 }
 0xd41   :  { %2946 = vmatpush.bf16.msra.mxu0 %v4323_v56 }
 0xdb1   :  { %v2292_v58 = vpop.f32.mrf.mxu0 }
 0xdb2   :  { %v2293_v59 = vadd.f32 %v4364_v57, %v2292_v58  ;;  %v4314_v57 = vld [vmem:[#allocation13 + $0x58] sm:$0xff] }
 0xdb3   :  { %v4306_v58 = vld [vmem:[#allocation13 + $0x18] sm:$0xff]  ;;  %2808 = vmatpush.bf16.msrb.mxu2 %v4314_v57 }
 0xdb4   :  { %v2296_v60 = vmax.f32 %v2293_v59, 0.0  ;;  %v4322_v59 = vld [vmem:[#allocation13 + $0x98] sm:$0xff]  ;;  %2869 = vmatpush.bf16.msrb.mxu3 %v4306_v58 }
 0xdb5   :  { %2947 = vmatpush.bf16.msra.mxu0 %v4322_v59 }
 0xdb6   :  { %v2297_v61 = vpack.c.bf16 %v2296_v60, %v2296_v60  ;;  %v4313_v60 = vld [vmem:[#allocation13 + $0x50] sm:$0xff] }
 0xdb7   :  { %2809 = vmatpush.bf16.msrb.mxu2 %v4313_v60 }
 0xdb8   :  { %2376 = vmatmul.bf16.vlgmr.msra.gmra.mxu1 %v2297_v61  ;;  %v4305_v61 = vld [vmem:[#allocation13 + $0x10] sm:$0xff] }
 0xdb9   :  { %v2294_v62 = vpop.f32.mrf.mxu0  ;;  %2870 = vmatpush.bf16.msrb.mxu3 %v4305_v61  ;;  %2948 = vmatpush.bf16.msra.mxu0 %v4321_v63 }
 0xdba   :  { %v4368_v62 = vld [vmem:[#allocation11 + $0x1c] ss:$0 sm:$0xff] }
 0xdbb   :  { %2810 = vmatpush.bf16.msrb.mxu2 %v4312_v0 }
 0xdbd   :  { %2871 = vmatpush.bf16.msrb.mxu3 %v4304_v2 }
 0xdbf   :  { %2811 = vmatpush.bf16.msrb.mxu2 %v4311_v4 }
 0xdc1   :  { %2872 = vmatpush.bf16.msrb.mxu3 %v4303_v5 }
 0xe35   :  { %v2377_v8 = vpop.f32.mrf.mxu1 }
 0xe36   :  { %v2378_v9 = vadd.f32 %v4365_v7, %v2377_v8 }
 0xe38   :  { %v2381_v10 = vmax.f32 %v2378_v9, 0.0  ;;  %v4320_v9 = vld [vmem:[#allocation13 + $0x88] sm:$0xff] }
 0xe39   :  { %2949 = vmatpush.bf16.msra.mxu0 %v4320_v9 }
 0xe3a   :  { %v2382_v11 = vpack.c.bf16 %v2381_v10, %v2381_v10  ;;  %v4319_v10 = vld [vmem:[#allocation13 + $0x80] sm:$0xff] }
 0xe3c   :  { %2461 = vmatmul.bf16.vlgmr.msra.gmra.mxu2 %v2382_v11  ;;  %v4369_v11 = vld [vmem:[#allocation11 + $0x1d] ss:$0 sm:$0xff] }
 0xe3d   :  { %v2379_v12 = vpop.f32.mrf.mxu1  ;;  %2950 = vmatpush.bf16.msra.mxu0 %v4319_v10 }
 0xe4c   :  { %2812 = vmatmul.bf16.vlgmr.msrb.gmra.mxu2 %v4677_v40 }
 0xebf   :  { %v2462_v24 = vpop.f32.mrf.mxu2 }
 0xec0   :  { %v2463_v25 = vadd.f32 %v4366_v23, %v2462_v24 }
 0xec2   :  { %v2466_v26 = vmax.f32 %v2463_v25, 0.0 }
 0xec4   :  { %v2467_v27 = vpack.c.bf16 %v2466_v26, %v2466_v26  ;;  %v4371_v26 = vld [vmem:[%s4698_s7] ss:$0 sm:$0xff] }
 0xec6   :  { %2546 = vmatmul.bf16.vlgmr.msra.gmra.mxu3 %v2467_v27 }
 0xec7   :  { %v2464_v28 = vpop.f32.mrf.mxu2 }
 0xecf   :  { %v2813_v18 = vpop.f32.mrf.mxu2 }
 0xed6   :  { %2873 = vmatmul.bf16.vlgmr.msrb.gmra.mxu3 %v4671_v22  ;;  %v4370_v22 = vld [vmem:[%s4697_s6] ss:$0 sm:$0xff] }
 0xed7   :  { %v2815_v21 = vpop.f32.mrf.mxu2 }
 0xf49   :  { %v2547_v38 = vpop.f32.mrf.mxu3 }
 0xf4a   :  { %v2548_v39 = vadd.f32 %v4367_v37, %v2547_v38 }
 0xf4c   :  { %v2551_v41 = vmax.f32 %v2548_v39, 0.0 }
 0xf4e   :  { %v2552_v42 = vpack.c.bf16 %v2551_v41, %v2551_v41 }
 0xf50   :  { %2631 = vmatmul.bf16.vlgmr.msrb.gmra.mxu0 %v2552_v42 }
 0xf51   :  { %v2549_v43 = vpop.f32.mrf.mxu3 }
 0xf59   :  { %v2874_v19 = vpop.f32.mrf.mxu3 }
 0xf5a   :  { %v2875_v20 = vadd.f32 %v2874_v19, %v2813_v18 }
 0xf61   :  { %v2876_v23 = vpop.f32.mrf.mxu3 }
 0xfcd   :  { %v2632_v32 = vpop.f32.mrf.mxu0 }
 0xfce   :  { %v2633_v3 = vadd.f32 %v4368_v62, %v2632_v32 }
 0xfd0   :  { %v2636_v6 = vmax.f32 %v2633_v3, 0.0 }
 0xfd2   :  { %v2637_v7 = vpack.c.bf16 %v2636_v6, %v2636_v6 }
 0xfd4   :  { %2716 = vmatmul.bf16.vlgmr.msrb.gmra.mxu1 %v2637_v7 }
 0xfd5   :  { %v2634_v8 = vpop.f32.mrf.mxu0 }
0x1051   :  { %v2717_v12 = vpop.f32.mrf.mxu1 }
0x1052   :  { %v2718_v14 = vadd.f32 %v4369_v11, %v2717_v12 }
0x1054   :  { %v2721_v15 = vmax.f32 %v2718_v14, 0.0 }
0x1056   :  { %v2722_v16 = vpack.c.bf16 %v2721_v15, %v2721_v15 }
0x1058   :  { %2951 = vmatmul.bf16.vlgmr.msra.gmra.mxu0 %v2722_v16 }
0x1059   :  { %v2719_v17 = vpop.f32.mrf.mxu1 }
0x10d5   :  { %v2952_v40 = vpop.f32.mrf.mxu0 }
0x10d6   :  { %v2956_v24 = vadd.f32 %v2952_v40, %v2875_v20 }
0x10d8   :  { %v2961_v25 = vadd.f32 %v4370_v22, %v2956_v24 }
0x10da   :  { %v2962_v27 = vmax.f32 %v2961_v25, 0.0 }
0x10dc   :  { %v2967_v28 = vmul.f32 %v4371_v26, %v2962_v27 }
0x10dd   :  { %v2954_v29 = vpop.f32.mrf.mxu0 }
0x10de   :  { %2968 = vadd.xlane.f32.xlu0 %v2967_v28 }
0x1151   :  { %v2969_v31 = vpop.xlane.xlu0 %2968 }
0x1152   :  { %v2974_v33 = vadd.f32 %v4372_v30, %v2969_v31 }
0x1154   :  { %2976 = vst.msk [vmem:[%s4700_s9] sm:$0xff] %vm2975_vm3, %v2974_v33 }
0x1155   :  { %2981 = vsyncpa [#allocation7], 1 }
0x1156   :  { %2982 = vsyncpa [#allocation9], 1 }
0x1157   :  { %2983 = vsyncpa [#allocation12], 1 }
0x1158   :  { %2984 = vsyncmov [#allocation4] }
0x115b   :  { %s2985_s6 = vpop.sfrf %2984 }
0x115c   :  { %p4060_p0 = scmp.ne.s32.totalorder %s2985_s6, 0 }
0x115e   :  { %2989 = shalt.err (%p4060_p0)  }
0x115f   :  { %2991 = vsyncmov [#allocation4 + $0x1] }
0x1162   :  { %s2992_s7 = vpop.sfrf %2991 }
0x1163   :  { %p4061_p1 = scmp.ne.s32.totalorder %s2992_s7, 0 }
0x1165   :  { %2996 = shalt.err (%p4061_p1)  }
0x1166   :  { %2998 = vsyncmov [#allocation4 + $0x2] }
0x1169   :  { %s2999_s11 = vpop.sfrf %2998 }
0x116a   :  { %p4062_p2 = scmp.ne.s32.totalorder %s2999_s11, 0 }
0x116c   :  { %3003 = shalt.err (%p4062_p2)  }

</bundles_post_ra>
